<compile_context>
chip_gen: v6e
topology: v6e:2x2x1
jax: 0.10.0
libtpu: 0.0.40
codegen_flags: <defaults>
</compile_context>

<pallas_src>
import functools
import math

import jax
import jax.numpy as jnp
from jax.experimental import pallas as pl
from jax.experimental.pallas import tpu as pltpu

LANES = 128  # TPU vreg lane width; all feature (last) dims are padded to this.
VMEM_LIMIT_BYTES = 32 * 1024 * 1024        # safe on v5e/v6e (128 MiB) and v7x (64 MiB)
XW_RESIDENT_MAX_BYTES = 8 * 1024 * 1024    # keep whole XW resident (incl. 2x buffers) below this


def _round_up(x, m):
    return (x + m - 1) // m * m


def _pad2d(arr, rows, cols):
    return jnp.pad(arr, ((0, rows - arr.shape[0]), (0, cols - arr.shape[1])))


def gcn_plan(n, *, tm=None, tk=None):
    """Pick node padding + aggregation tile sizes.

    Returns (n_pad, tm, tk) with n_pad divisible by both tm and tk, tk a multiple of
    128 (lane width), tm sublane-aligned, and — when possible — at least 2 blocks on
    the parallel row axis so v7x's two TensorCores both get work.
    """
    if tk is None:
        tk = min(512, _round_up(n, LANES))
    if tm is None:
        tm = tk
    assert tk % LANES == 0, "tk must be a multiple of 128 (lane width)"
    assert tm % 8 == 0, "tm must be a multiple of 8 (sublane width)"
    n_pad = _round_up(n, math.lcm(tm, tk))
    # v7x megacore: prefer >= 2 blocks on the parallel (row) grid axis.
    if n_pad // tm < 2 and n_pad >= 256:
        tm = n_pad // 2  # n_pad is a multiple of 128 -> tm is a multiple of 64 (>= 8)
    assert n_pad % tm == 0 and n_pad % tk == 0
    return n_pad, tm, tk


def prepare_adjacency(a_hat, n_pad, dtype=jnp.bfloat16):
    """Pad + cast Ahat once; the caller caches the result across forward calls.

    (Perf review: hoisting this out of the forward removes ~6*N^2 bytes of HBM
    traffic per call.)  v7x-only option: dtype=jnp.float8_e4m3fn halves the dominant
    HBM stream there; keep bf16 on v5e/v6e whose MXUs have no fp8 path.
    """
    return _pad2d(a_hat, n_pad, n_pad).astype(dtype)


# -----------------------------------------------------------------------------
# Kernel 1: dense feature transform  XW = X @ W   (bf16 in, f32 acc, bf16 out)
# -----------------------------------------------------------------------------
def _xw_kernel(x_ref, w_ref, o_ref):
    o_ref[...] = jnp.dot(
        x_ref[...], w_ref[...], preferred_element_type=jnp.float32
    ).astype(o_ref.dtype)


def _feature_transform(x_bf16, w_bf16, *, rows):
    n_pad, fin_pad = x_bf16.shape
    fout_pad = w_bf16.shape[1]
    return pl.pallas_call(
        _xw_kernel,
        out_shape=jax.ShapeDtypeStruct((n_pad, fout_pad), jnp.bfloat16),
        grid_spec=pltpu.PrefetchScalarGridSpec(
            num_scalar_prefetch=0,
            grid=(n_pad // rows,),
            in_specs=[
                pl.BlockSpec((rows, fin_pad), lambda i: (i, 0)),
                pl.BlockSpec((fin_pad, fout_pad), lambda i: (0, 0)),
            ],
            out_specs=pl.BlockSpec((rows, fout_pad), lambda i: (i, 0)),
        ),
        compiler_params=pltpu.CompilerParams(
            dimension_semantics=("parallel",),
            vmem_limit_bytes=VMEM_LIMIT_BYTES,
        ),
        cost_estimate=pl.CostEstimate(
            flops=2 * n_pad * fin_pad * fout_pad,
            transcendentals=0,
            bytes_accessed=2 * (n_pad * fin_pad + fin_pad * fout_pad + n_pad * fout_pad),
        ),
    )(x_bf16, w_bf16)


# -----------------------------------------------------------------------------
# Kernel 2: aggregation  ACC = Ahat @ XW  (row-tiled, reduction over Ahat columns)
#   mode == "relu_w2" : finalize emits  relu(ACC + b1) @ W2        (layer 1, fused)
#   mode == "softmax" : finalize emits  softmax(ACC + b2, axis=1)  (layer 2)
# -----------------------------------------------------------------------------
def _agg_kernel(a_ref, xw_ref, b_ref, *rest, mode, tk, xw_resident, valid_out):
    if mode == "relu_w2":
        w2_ref, o_ref, acc_ref = rest
    else:
        o_ref, acc_ref = rest

    k = pl.program_id(1)

    @pl.when(k == 0)
    def _():
        acc_ref[...] = jnp.zeros_like(acc_ref)

    if xw_resident:
        # Whole XW lives in VMEM (loaded once); slice the reduction chunk.
        off = pl.multiple_of(k * tk, tk)
        xw = xw_ref[pl.ds(off, tk), :]
    else:
        xw = xw_ref[...]
    acc_ref[...] += jnp.dot(a_ref[...], xw, preferred_element_type=jnp.float32)

    @pl.when(k == pl.num_programs(1) - 1)
    def _():
        h = acc_ref[...] + b_ref[...]  # bias added once, in the finalize phase
        if mode == "relu_w2":
            # Fused layer-2 feature transform: one extra 128-wide MXU op in a
            # memory-bound finalize; removes a separate pallas_call + HBM round trip.
            hr = jnp.maximum(h, 0.0).astype(jnp.bfloat16)
            o_ref[...] = jnp.dot(
                hr, w2_ref[...], preferred_element_type=jnp.float32
            ).astype(o_ref.dtype)
        else:
            # Masked softmax over the (padded) feature axis; exact renormalization.
            lane = jax.lax.broadcasted_iota(jnp.int32, h.shape, 1)
            mask = lane < valid_out
            hm = jnp.where(mask, h, -jnp.inf)
            m = jnp.max(hm, axis=1, keepdims=True)
            e = jnp.where(mask, jnp.exp(hm - m), 0.0)
            s = jnp.sum(e, axis=1, keepdims=True)
            o_ref[...] = (e / s).astype(o_ref.dtype)


def _aggregate(a_p, xw, b_row, w2=None, *, mode, valid_out, out_dtype, tm, tk):
    n_pad = a_p.shape[0]
    xw_cols = xw.shape[1]
    out_cols = w2.shape[1] if mode == "relu_w2" else xw_cols

    # Keep the full XW resident in VMEM when small (avoids re-streaming it once per
    # Ahat row-tile); otherwise stream (tk, xw_cols) tiles along the reduction axis.
    xw_bytes = n_pad * xw_cols * xw.dtype.itemsize
    xw_resident = 2 * xw_bytes <= XW_RESIDENT_MAX_BYTES
    if xw_resident:
        xw_spec = pl.BlockSpec((n_pad, xw_cols), lambda i, k: (0, 0))
    else:
        xw_spec = pl.BlockSpec((tk, xw_cols), lambda i, k: (k, 0))

    in_specs = [
        # Ahat tile.  v5e note: add pipeline_mode=pl.Buffered(3) here if a profile
        # shows exposed DMA on that bandwidth-starved generation.
        pl.BlockSpec((tm, tk), lambda i, k: (i, k)),
        xw_spec,
        pl.BlockSpec((1, xw_cols), lambda i, k: (0, 0)),  # bias row (finalize only)
    ]
    operands = [a_p, xw, b_row]
    if mode == "relu_w2":
        in_specs.append(pl.BlockSpec(w2.shape, lambda i, k: (0, 0)))  # W2 resident (32 KiB)
        operands.append(w2)

    kernel = functools.partial(
        _agg_kernel, mode=mode, tk=tk, xw_resident=xw_resident, valid_out=valid_out
    )
    n_exp = n_pad * xw_cols if mode == "softmax" else 0
    fused_flops = 2 * n_pad * xw_cols * out_cols if mode == "relu_w2" else 0
    xw_stream_factor = 1 if xw_resident else (n_pad // tm)
    return pl.pallas_call(
        kernel,
        out_shape=jax.ShapeDtypeStruct((n_pad, out_cols), out_dtype),
        grid_spec=pltpu.PrefetchScalarGridSpec(
            num_scalar_prefetch=0,
            grid=(n_pad // tm, n_pad // tk),
            in_specs=in_specs,
            out_specs=pl.BlockSpec((tm, out_cols), lambda i, k: (i, 0)),
            scratch_shapes=[pltpu.VMEM((tm, xw_cols), jnp.float32)],
        ),
        compiler_params=pltpu.CompilerParams(
            dimension_semantics=("parallel", "arbitrary"),
            vmem_limit_bytes=VMEM_LIMIT_BYTES,
        ),
        cost_estimate=pl.CostEstimate(
            flops=2 * n_pad * n_pad * xw_cols + fused_flops,
            transcendentals=n_exp,
            bytes_accessed=a_p.dtype.itemsize * n_pad * n_pad
            + xw_bytes * xw_stream_factor
            + n_pad * out_cols * jnp.dtype(out_dtype).itemsize,
        ),
    )(*operands)


# -----------------------------------------------------------------------------
# Full GCN forward.  a_p is the pre-padded bf16 Ahat from prepare_adjacency
# (hoisted out of the jitted forward and cached by the caller).
# -----------------------------------------------------------------------------
@functools.partial(jax.jit, static_argnames=("tm", "tk"))
def gcn_forward(a_p, x, w1, b1, w2, b2, *, tm, tk):
    n, in_feats = x.shape
    hid_feats = w1.shape[1]
    out_feats = w2.shape[1]
    n_pad = a_p.shape[0]
    assert n_pad >= n and n_pad % tm == 0 and n_pad % tk == 0, (
        "a_p padding inconsistent with (tm, tk); use gcn_plan/prepare_adjacency"
    )

    fin_pad = _round_up(in_feats, LANES)
    hid_pad = _round_up(hid_feats, LANES)
    out_pad = _round_up(out_feats, LANES)

    # Lane-dense, tile-aligned, bf16 MXU inputs (f32 accumulation inside kernels).
    x_p = _pad2d(x, n_pad, fin_pad).astype(jnp.bfloat16)
    w1_p = _pad2d(w1, fin_pad, hid_pad).astype(jnp.bfloat16)
    w2_p = _pad2d(w2, hid_pad, out_pad).astype(jnp.bfloat16)
    b1_p = _pad2d(b1.reshape(1, -1).astype(jnp.float32), 1, hid_pad)
    b2_p = _pad2d(b2.reshape(1, -1).astype(jnp.float32), 1, out_pad)

    # Dense feature transform for layer 1 only (layer 2's transform is fused into the
    # layer-1 aggregation finalize).  One big row block for moderate N; 512-row tiles
    # for very large graphs.
    ft_rows = n_pad if n_pad <= 4096 else tk
    xw1 = _feature_transform(x_p, w1_p, rows=ft_rows)

    # Layer 1 + fused layer-2 transform:  hw2 = relu(Ahat @ xw1 + b1) @ W2
    hw2 = _aggregate(a_p, xw1, b1_p, w2_p, mode="relu_w2", valid_out=hid_feats,
                     out_dtype=jnp.bfloat16, tm=tm, tk=tk)

    # Layer 2:  out = softmax(Ahat @ hw2 + b2, axis=1)
    out = _aggregate(a_p, hw2, b2_p, mode="softmax", valid_out=out_feats,
                     out_dtype=jnp.float32, tm=tm, tk=tk)

    return out[:n, :out_feats]


# -----------------------------------------------------------------------------
# Host-side glue: graph normalization, init, reference, test.
# -----------------------------------------------------------------------------
def build_normalized_adjacency(key, n):
    """Random symmetric graph with self-loops, symmetric norm D^-1/2 A D^-1/2."""
    a = (jax.random.uniform(key, (n, n)) < 0.05).astype(jnp.float32)
    a = jnp.maximum(a, a.T)
    a = jnp.maximum(a, jnp.eye(n, dtype=jnp.float32))
    deg = jnp.sum(a, axis=1)
    d_inv_sqrt = 1.0 / jnp.sqrt(deg)
    return a * d_inv_sqrt[:, None] * d_inv_sqrt[None, :]


def gcn_reference(a_hat, x, w1, b1, w2, b2):
    """Pure-JAX reference mirroring the kernel's bf16-MXU / f32-accumulate math."""
    a = a_hat.astype(jnp.bfloat16)

    def layer(h_in, w, b):
        xw = jnp.dot(h_in.astype(jnp.bfloat16), w.astype(jnp.bfloat16),
                     preferred_element_type=jnp.float32).astype(jnp.bfloat16)
        return jnp.dot(a, xw, preferred_element_type=jnp.float32) + b.reshape(1, -1)

    h = jnp.maximum(layer(x, w1, b1), 0.0)
    h2 = layer(h, w2, b2)
    return jax.nn.softmax(h2, axis=1)


if __name__ == "__main__":
    # Small shapes consistent with GCN(in_feats, hid_feats, out_feats); N chosen
    # non-multiple of 128 so padding + the 2-block parallel row axis is exercised.
    N = 300
    IN_FEATS = 8
    HID_FEATS = 32
    OUT_FEATS = 4

    key = jax.random.PRNGKey(0)
    k_adj, k_x, k_w1, k_b1, k_w2, k_b2 = jax.random.split(key, 6)

    a_hat = build_normalized_adjacency(k_adj, N)
    x = jax.random.normal(k_x, (N, IN_FEATS), dtype=jnp.float32)

    def glorot(k, shape):
        fan_in, fan_out = shape
        limit = jnp.sqrt(6.0 / (fan_in + fan_out))
        return jax.random.uniform(k, shape, minval=-limit, maxval=limit,
                                  dtype=jnp.float32)

    w1 = glorot(k_w1, (IN_FEATS, HID_FEATS))
    b1 = 0.1 * jax.random.normal(k_b1, (HID_FEATS,), dtype=jnp.float32)
    w2 = glorot(k_w2, (HID_FEATS, OUT_FEATS))
    b2 = 0.1 * jax.random.normal(k_b2, (OUT_FEATS,), dtype=jnp.float32)

    # Plan tiles once, pad/cast Ahat once (cached across calls), then run.
    n_pad, tm, tk = gcn_plan(N)
    a_p = jax.block_until_ready(prepare_adjacency(a_hat, n_pad))

    out = gcn_forward(a_p, x, w1, b1, w2, b2, tm=tm, tk=tk)
    out = jax.block_until_ready(out)

    # Sanity / correctness checks.
    assert out.shape == (N, OUT_FEATS)
    assert bool(jnp.all(jnp.isfinite(out)))
    assert bool(jnp.allclose(jnp.sum(out, axis=1), 1.0, atol=1e-4))  # exact renorm
    ref = gcn_reference(a_hat, x, w1, b1, w2, b2)
    assert bool(jnp.allclose(out, ref, atol=1e-2)), float(jnp.max(jnp.abs(out - ref)))

    print("KERNEL_OK")
</pallas_src>

<mosaic_0001>
module attributes {stable_mosaic.version = 11 : i64} {
  func.func @_xw_kernel(%arg0: i32, %arg1: memref<384x128xbf16, #tpu.memory_space<vmem>>, %arg2: memref<128x128xbf16, #tpu.memory_space<vmem>>, %arg3: memref<384x128xbf16, #tpu.memory_space<vmem>>) attributes {dimension_semantics = [#tpu.dimension_semantics<parallel>], iteration_bounds = array<i64: 1>, scalar_prefetch = 0 : i64, scratch_operands = 0 : i64, tpu.core_type = #tpu.core_type<tc>, window_params = [{transform_indices = @transform_0, window_bounds = array<i64: 384, 128>}, {pipeline_mode = #tpu.pipeline_mode<synchronous>, transform_indices = @transform_1, window_bounds = array<i64: 128, 128>}, {transform_indices = @transform_2, window_bounds = array<i64: 384, 128>}]} {
    %c0 = arith.constant 0 : index
    %c0_0 = arith.constant 0 : index
    %0 = vector.load %arg1[%c0, %c0_0] : memref<384x128xbf16, #tpu.memory_space<vmem>>, vector<384x128xbf16>
    %c0_1 = arith.constant 0 : index
    %c0_2 = arith.constant 0 : index
    %1 = vector.load %arg2[%c0_1, %c0_2] : memref<128x128xbf16, #tpu.memory_space<vmem>>, vector<128x128xbf16>
    %cst = arith.constant dense<0.000000e+00> : vector<384x128xf32>
    %2 = tpu.matmul %0, %1, %cst {dimension_numbers = #tpu.dot_dimension_numbers<[1], [0], [0], [1], [0, 0, 1, 1], [], []>} : vector<384x128xbf16>, vector<128x128xbf16>, vector<384x128xf32> -> vector<384x128xf32>
    %3 = arith.truncf %2 : vector<384x128xf32> to vector<384x128xbf16>
    %c0_3 = arith.constant 0 : index
    %c0_4 = arith.constant 0 : index
    %4 = vector.load %arg3[%c0_3, %c0_4] : memref<384x128xbf16, #tpu.memory_space<vmem>>, vector<384x128xbf16>
    tpu.vector_store %arg3[%c0_3, %c0_4], %3 {strides = array<i32>} : memref<384x128xbf16, #tpu.memory_space<vmem>>, vector<384x128xbf16>,
    return
  }
  func.func @transform_0(%arg0: i32) -> (i32, i32) {
    %c0_i32 = arith.constant 0 : i32
    %c0_i32_0 = arith.constant 0 : i32
    return %arg0, %c0_i32 : i32, i32
  }
  func.func @transform_1(%arg0: i32) -> (i32, i32) {
    %c0_i32 = arith.constant 0 : i32
    %c0_i32_0 = arith.constant 0 : i32
    %c0_i32_1 = arith.constant 0 : i32
    return %c0_i32, %c0_i32_0 : i32, i32
  }
  func.func @transform_2(%arg0: i32) -> (i32, i32) {
    %c0_i32 = arith.constant 0 : i32
    %c0_i32_0 = arith.constant 0 : i32
    return %arg0, %c0_i32 : i32, i32
  }
}

module attributes {stable_mosaic.version = 11 : i64} {
  func.func @_agg_kernel(%arg0: i32, %arg1: i32, %arg2: memref<192x384xbf16, #tpu.memory_space<vmem>>, %arg3: memref<384x128xbf16, #tpu.memory_space<vmem>>, %arg4: memref<1x128xf32, #tpu.memory_space<vmem>>, %arg5: memref<192x128xf32, #tpu.memory_space<vmem>>, %arg6: memref<192x128xf32, #tpu.memory_space<vmem>>) attributes {dimension_semantics = [#tpu.dimension_semantics<parallel>, #tpu.dimension_semantics<arbitrary>], iteration_bounds = array<i64: 2, 1>, scalar_prefetch = 0 : i64, scratch_operands = 1 : i64, tpu.core_type = #tpu.core_type<tc>, window_params = [{transform_indices = @transform_0, window_bounds = array<i64: 192, 384>}, {pipeline_mode = #tpu.pipeline_mode<synchronous>, transform_indices = @transform_1, window_bounds = array<i64: 384, 128>}, {pipeline_mode = #tpu.pipeline_mode<synchronous>, transform_indices = @transform_2, window_bounds = array<i64: 1, 128>}, {transform_indices = @transform_3, window_bounds = array<i64: 192, 128>}]} {
    %c0_i32 = arith.constant 0 : i32
    %0 = arith.cmpi eq, %arg1, %c0_i32 : i32
    %1 = arith.extui %0 : i1 to i32
    %c0_i32_0 = arith.constant 0 : i32
    %2 = arith.cmpi ne, %1, %c0_i32_0 : i32
    scf.if %2 {
      %cst_9 = arith.constant 0.000000e+00 : f32
      %15 = vector.broadcast %cst_9 : f32 to vector<192x128xf32>
      %c0_10 = arith.constant 0 : index
      %c0_11 = arith.constant 0 : index
      %16 = vector.load %arg6[%c0_10, %c0_11] : memref<192x128xf32, #tpu.memory_space<vmem>>, vector<192x128xf32>
      tpu.vector_store %arg6[%c0_10, %c0_11], %15 {strides = array<i32>} : memref<192x128xf32, #tpu.memory_space<vmem>>, vector<192x128xf32>,
    } else {
    }
    %c384_i32 = arith.constant 384 : i32
    %3 = arith.muli %arg1, %c384_i32 : i32
    %4 = tpu.assume_multiple %3, 384 : i32
    %5 = arith.index_cast %4 : i32 to index
    %c0 = arith.constant 0 : index
    %6 = vector.load %arg3[%5, %c0] : memref<384x128xbf16, #tpu.memory_space<vmem>>, vector<384x128xbf16>
    %c0_1 = arith.constant 0 : index
    %c0_2 = arith.constant 0 : index
    %7 = vector.load %arg6[%c0_1, %c0_2] : memref<192x128xf32, #tpu.memory_space<vmem>>, vector<192x128xf32>
    %c0_3 = arith.constant 0 : index
    %c0_4 = arith.constant 0 : index
    %8 = vector.load %arg2[%c0_3, %c0_4] : memref<192x384xbf16, #tpu.memory_space<vmem>>, vector<192x384xbf16>
    %cst = arith.constant dense<0.000000e+00> : vector<192x128xf32>
    %9 = tpu.matmul %8, %6, %cst {dimension_numbers = #tpu.dot_dimension_numbers<[1], [0], [0], [1], [0, 0, 1, 1], [], []>} : vector<192x384xbf16>, vector<384x128xbf16>, vector<192x128xf32> -> vector<192x128xf32>
    %10 = arith.addf %7, %9 : vector<192x128xf32>
    %c0_5 = arith.constant 0 : index
    %c0_6 = arith.constant 0 : index
    %11 = vector.load %arg6[%c0_5, %c0_6] : memref<192x128xf32, #tpu.memory_space<vmem>>, vector<192x128xf32>
    tpu.vector_store %arg6[%c0_5, %c0_6], %10 {strides = array<i32>} : memref<192x128xf32, #tpu.memory_space<vmem>>, vector<192x128xf32>,
    %c0_i32_7 = arith.constant 0 : i32
    %12 = arith.cmpi eq, %arg1, %c0_i32_7 : i32
    %13 = arith.extui %12 : i1 to i32
    %c0_i32_8 = arith.constant 0 : i32
    %14 = arith.cmpi ne, %13, %c0_i32_8 : i32
    scf.if %14 {
      %c0_9 = arith.constant 0 : index
      %c0_10 = arith.constant 0 : index
      %15 = vector.load %arg6[%c0_9, %c0_10] : memref<192x128xf32, #tpu.memory_space<vmem>>, vector<192x128xf32>
      %c0_11 = arith.constant 0 : index
      %c0_12 = arith.constant 0 : index
      %16 = vector.load %arg4[%c0_11, %c0_12] : memref<1x128xf32, #tpu.memory_space<vmem>>, vector<1x128xf32>
      %17 = vector.broadcast %16 : vector<1x128xf32> to vector<192x128xf32>
      %18 = arith.addf %15, %17 : vector<192x128xf32>
      %19 = tpu.iota {dimensions = array<i32: 1>} : vector<192x128xi32>
      %c4_i32 = arith.constant 4 : i32
      %20 = vector.broadcast %c4_i32 : i32 to vector<192x128xi32>
      %21 = arith.cmpi slt, %19, %20 : vector<192x128xi32>
      %cst_13 = arith.constant 0xFF800000 : f32
      %22 = vector.broadcast %cst_13 : f32 to vector<192x128xf32>
      %23 = arith.select %21, %18, %22 : vector<192x128xi1>, vector<192x128xf32>
      %cst_14 = arith.constant dense<0xFF800000> : vector<192xf32>
      %24 = vector.multi_reduction <maximumf>, %23, %cst_14 [1] : vector<192x128xf32> to vector<192xf32>
      %25 = vector.shape_cast %24 : vector<192xf32> to vector<192x1xf32>
      %26 = vector.broadcast %25 : vector<192x1xf32> to vector<192x128xf32>
      %27 = arith.subf %23, %26 : vector<192x128xf32>
      %28 = math.exp %27 : vector<192x128xf32>
      %cst_15 = arith.constant 0.000000e+00 : f32
      %29 = vector.broadcast %cst_15 : f32 to vector<192x128xf32>
      %30 = arith.select %21, %28, %29 : vector<192x128xi1>, vector<192x128xf32>
      %cst_16 = arith.constant dense<0.000000e+00> : vector<192xf32>
      %31 = vector.multi_reduction <add>, %30, %cst_16 [1] : vector<192x128xf32> to vector<192xf32>
      %32 = vector.shape_cast %31 : vector<192xf32> to vector<192x1xf32>
      %33 = vector.broadcast %32 : vector<192x1xf32> to vector<192x128xf32>
      %34 = arith.divf %30, %33 : vector<192x128xf32>
      %c0_17 = arith.constant 0 : index
      %c0_18 = arith.constant 0 : index
      %35 = vector.load %arg5[%c0_17, %c0_18] : memref<192x128xf32, #tpu.memory_space<vmem>>, vector<192x128xf32>
      tpu.vector_store %arg5[%c0_17, %c0_18], %34 {strides = array<i32>} : memref<192x128xf32, #tpu.memory_space<vmem>>, vector<192x128xf32>,
    } else {
    }
    return
  }
  func.func @transform_0(%arg0: i32, %arg1: i32) -> (i32, i32) {
    %c0_i32 = arith.constant 0 : i32
    return %arg0, %arg1 : i32, i32
  }
  func.func @transform_1(%arg0: i32, %arg1: i32) -> (i32, i32) {
    %c0_i32 = arith.constant 0 : i32
    %c0_i32_0 = arith.constant 0 : i32
    %c0_i32_1 = arith.constant 0 : i32
    return %c0_i32, %c0_i32_0 : i32, i32
  }
  func.func @transform_2(%arg0: i32, %arg1: i32) -> (i32, i32) {
    %c0_i32 = arith.constant 0 : i32
    %c0_i32_0 = arith.constant 0 : i32
    %c0_i32_1 = arith.constant 0 : i32
    return %c0_i32, %c0_i32_0 : i32, i32
  }
  func.func @transform_3(%arg0: i32, %arg1: i32) -> (i32, i32) {
    %c0_i32 = arith.constant 0 : i32
    %c0_i32_0 = arith.constant 0 : i32
    return %arg0, %c0_i32 : i32, i32
  }
}

module attributes {stable_mosaic.version = 11 : i64} {
  func.func @_agg_kernel(%arg0: i32, %arg1: i32, %arg2: memref<192x384xbf16, #tpu.memory_space<vmem>>, %arg3: memref<384x128xbf16, #tpu.memory_space<vmem>>, %arg4: memref<1x128xf32, #tpu.memory_space<vmem>>, %arg5: memref<128x128xbf16, #tpu.memory_space<vmem>>, %arg6: memref<192x128xbf16, #tpu.memory_space<vmem>>, %arg7: memref<192x128xf32, #tpu.memory_space<vmem>>) attributes {dimension_semantics = [#tpu.dimension_semantics<parallel>, #tpu.dimension_semantics<arbitrary>], iteration_bounds = array<i64: 2, 1>, scalar_prefetch = 0 : i64, scratch_operands = 1 : i64, tpu.core_type = #tpu.core_type<tc>, window_params = [{transform_indices = @transform_0, window_bounds = array<i64: 192, 384>}, {pipeline_mode = #tpu.pipeline_mode<synchronous>, transform_indices = @transform_1, window_bounds = array<i64: 384, 128>}, {pipeline_mode = #tpu.pipeline_mode<synchronous>, transform_indices = @transform_2, window_bounds = array<i64: 1, 128>}, {pipeline_mode = #tpu.pipeline_mode<synchronous>, transform_indices = @transform_3, window_bounds = array<i64: 128, 128>}, {transform_indices = @transform_4, window_bounds = array<i64: 192, 128>}]} {
    %c0_i32 = arith.constant 0 : i32
    %0 = arith.cmpi eq, %arg1, %c0_i32 : i32
    %1 = arith.extui %0 : i1 to i32
    %c0_i32_0 = arith.constant 0 : i32
    %2 = arith.cmpi ne, %1, %c0_i32_0 : i32
    scf.if %2 {
      %cst_9 = arith.constant 0.000000e+00 : f32
      %15 = vector.broadcast %cst_9 : f32 to vector<192x128xf32>
      %c0_10 = arith.constant 0 : index
      %c0_11 = arith.constant 0 : index
      %16 = vector.load %arg7[%c0_10, %c0_11] : memref<192x128xf32, #tpu.memory_space<vmem>>, vector<192x128xf32>
      tpu.vector_store %arg7[%c0_10, %c0_11], %15 {strides = array<i32>} : memref<192x128xf32, #tpu.memory_space<vmem>>, vector<192x128xf32>,
    } else {
    }
    %c384_i32 = arith.constant 384 : i32
    %3 = arith.muli %arg1, %c384_i32 : i32
    %4 = tpu.assume_multiple %3, 384 : i32
    %5 = arith.index_cast %4 : i32 to index
    %c0 = arith.constant 0 : index
    %6 = vector.load %arg3[%5, %c0] : memref<384x128xbf16, #tpu.memory_space<vmem>>, vector<384x128xbf16>
    %c0_1 = arith.constant 0 : index
    %c0_2 = arith.constant 0 : index
    %7 = vector.load %arg7[%c0_1, %c0_2] : memref<192x128xf32, #tpu.memory_space<vmem>>, vector<192x128xf32>
    %c0_3 = arith.constant 0 : index
    %c0_4 = arith.constant 0 : index
    %8 = vector.load %arg2[%c0_3, %c0_4] : memref<192x384xbf16, #tpu.memory_space<vmem>>, vector<192x384xbf16>
    %cst = arith.constant dense<0.000000e+00> : vector<192x128xf32>
    %9 = tpu.matmul %8, %6, %cst {dimension_numbers = #tpu.dot_dimension_numbers<[1], [0], [0], [1], [0, 0, 1, 1], [], []>} : vector<192x384xbf16>, vector<384x128xbf16>, vector<192x128xf32> -> vector<192x128xf32>
    %10 = arith.addf %7, %9 : vector<192x128xf32>
    %c0_5 = arith.constant 0 : index
    %c0_6 = arith.constant 0 : index
    %11 = vector.load %arg7[%c0_5, %c0_6] : memref<192x128xf32, #tpu.memory_space<vmem>>, vector<192x128xf32>
    tpu.vector_store %arg7[%c0_5, %c0_6], %10 {strides = array<i32>} : memref<192x128xf32, #tpu.memory_space<vmem>>, vector<192x128xf32>,
    %c0_i32_7 = arith.constant 0 : i32
    %12 = arith.cmpi eq, %arg1, %c0_i32_7 : i32
    %13 = arith.extui %12 : i1 to i32
    %c0_i32_8 = arith.constant 0 : i32
    %14 = arith.cmpi ne, %13, %c0_i32_8 : i32
    scf.if %14 {
      %c0_9 = arith.constant 0 : index
      %c0_10 = arith.constant 0 : index
      %15 = vector.load %arg7[%c0_9, %c0_10] : memref<192x128xf32, #tpu.memory_space<vmem>>, vector<192x128xf32>
      %c0_11 = arith.constant 0 : index
      %c0_12 = arith.constant 0 : index
      %16 = vector.load %arg4[%c0_11, %c0_12] : memref<1x128xf32, #tpu.memory_space<vmem>>, vector<1x128xf32>
      %17 = vector.broadcast %16 : vector<1x128xf32> to vector<192x128xf32>
      %18 = arith.addf %15, %17 : vector<192x128xf32>
      %cst_13 = arith.constant 0.000000e+00 : f32
      %19 = vector.broadcast %cst_13 : f32 to vector<192x128xf32>
      %20 = arith.maximumf %18, %19 : vector<192x128xf32>
      %21 = arith.truncf %20 : vector<192x128xf32> to vector<192x128xbf16>
      %c0_14 = arith.constant 0 : index
      %c0_15 = arith.constant 0 : index
      %22 = vector.load %arg5[%c0_14, %c0_15] : memref<128x128xbf16, #tpu.memory_space<vmem>>, vector<128x128xbf16>
      %cst_16 = arith.constant dense<0.000000e+00> : vector<192x128xf32>
      %23 = tpu.matmul %21, %22, %cst_16 {dimension_numbers = #tpu.dot_dimension_numbers<[1], [0], [0], [1], [0, 0, 1, 1], [], []>} : vector<192x128xbf16>, vector<128x128xbf16>, vector<192x128xf32> -> vector<192x128xf32>
      %24 = arith.truncf %23 : vector<192x128xf32> to vector<192x128xbf16>
      %c0_17 = arith.constant 0 : index
      %c0_18 = arith.constant 0 : index
      %25 = vector.load %arg6[%c0_17, %c0_18] : memref<192x128xbf16, #tpu.memory_space<vmem>>, vector<192x128xbf16>
      tpu.vector_store %arg6[%c0_17, %c0_18], %24 {strides = array<i32>} : memref<192x128xbf16, #tpu.memory_space<vmem>>, vector<192x128xbf16>,
    } else {
    }
    return
  }
  func.func @transform_0(%arg0: i32, %arg1: i32) -> (i32, i32) {
    %c0_i32 = arith.constant 0 : i32
    return %arg0, %arg1 : i32, i32
  }
  func.func @transform_1(%arg0: i32, %arg1: i32) -> (i32, i32) {
    %c0_i32 = arith.constant 0 : i32
    %c0_i32_0 = arith.constant 0 : i32
    %c0_i32_1 = arith.constant 0 : i32
    return %c0_i32, %c0_i32_0 : i32, i32
  }
  func.func @transform_2(%arg0: i32, %arg1: i32) -> (i32, i32) {
    %c0_i32 = arith.constant 0 : i32
    %c0_i32_0 = arith.constant 0 : i32
    %c0_i32_1 = arith.constant 0 : i32
    return %c0_i32, %c0_i32_0 : i32, i32
  }
  func.func @transform_3(%arg0: i32, %arg1: i32) -> (i32, i32) {
    %c0_i32 = arith.constant 0 : i32
    %c0_i32_0 = arith.constant 0 : i32
    %c0_i32_1 = arith.constant 0 : i32
    return %c0_i32, %c0_i32_0 : i32, i32
  }
  func.func @transform_4(%arg0: i32, %arg1: i32) -> (i32, i32) {
    %c0_i32 = arith.constant 0 : i32
    %c0_i32_0 = arith.constant 0 : i32
    return %arg0, %c0_i32 : i32, i32
  }
}

</mosaic_0001>

<bundles_post_ra>
// kernel: gcn_forward.3
= control target key start
LH: loop header
LB: loop body
LE: loop exit
PB: predicated region body
PF: predicated region fallthrough
CT: control target
= control target key end

     0   :  { %s1335_s1 = inlined_call_operand.vmem [shape: bf16[128,128], index: 1, kind: input, shape index: {}]   ;;  %s1336_s0 = inlined_call_operand.vmem [shape: bf16[384,128], index: 0, kind: input, shape index: {}]   ;;  %s1337_s2 = inlined_call_operand.vmem [shape: bf16[384,128], index: 2, kind: output, shape index: {}]  }
   0x1   :  { %v1120_v0 = vld [vmem:[%s1335_s1 + $0x38] sm:$0xff]   ;;  %v1121_v1 = vld [vmem:[%s1335_s1 + $0x30] sm:$0xff]   ;;  %v1122_v2 = vld [vmem:[%s1335_s1 + $0x28] sm:$0xff]  }
   0x2   :  { %1040 = vmatprep.subr.bf16.mxu0 %v1120_v0  ;;  %1104 = vmatprep.subr.bf16.mxu1 %v1120_v0  ;;  %v1123_v3 = vld [vmem:[%s1335_s1 + $0x20] sm:$0xff]   ;;  %v1124_v6 = vld [vmem:[%s1335_s1 + $0x18] sm:$0xff]   ;;  %v1125_v7 = vld [vmem:[%s1335_s1 + $0x10] sm:$0xff]  }
   0x3   :  { %1041 = vmatpush3.bf16.msra.mxu0 %v1120_v0  ;;  %1112 = vmatpush3.bf16.msra.mxu1 %v1120_v0  ;;  %v1128_v4 = vld [vmem:[%s1336_s0] sm:$0xff]   ;;  %v1126_v8 = vld [vmem:[%s1335_s1 + $0x8] sm:$0xff]   ;;  %v1132_v12 = vld [vmem:[%s1336_s0 + $0x10] sm:$0xff]  }
   0x4   :  { %1042 = vmatprep.subr.bf16.mxu0 %v1121_v1  ;;  %1105 = vmatprep.subr.bf16.mxu1 %v1121_v1  ;;  %v1129_v5 = vld [vmem:[%s1336_s0 + $0x60] sm:$0xff]   ;;  %v1130_v10 = vld [vmem:[%s1336_s0 + $0x8] sm:$0xff]   ;;  %v1133_v13 = vld [vmem:[%s1336_s0 + $0x70] sm:$0xff]  }
   0x5   :  { %1056 = vmatprep.mubr.bf16.mxu0 %v1128_v4  ;;  %1080 = vmatprep.mubr.bf16.mxu1 %v1129_v5  ;;  %v1127_v9 = vld [vmem:[%s1335_s1] sm:$0xff]   ;;  %v1131_v11 = vld [vmem:[%s1336_s0 + $0x68] sm:$0xff]   ;;  %v1134_v14 = vld [vmem:[%s1336_s0 + $0x18] sm:$0xff]  }
   0x6   :  { %v1135_v15 = vld [vmem:[%s1336_s0 + $0x78] sm:$0xff]   ;;  %v1136_v16 = vld [vmem:[%s1336_s0 + $0x20] sm:$0xff]   ;;  %v1138_v18 = vld [vmem:[%s1336_s0 + $0x28] sm:$0xff]  }
   0x7   :  { %1043 = vmatpush3.bf16.msra.mxu0 %v1121_v1  ;;  %1113 = vmatpush3.bf16.msra.mxu1 %v1121_v1  ;;  %v1137_v17 = vld [vmem:[%s1336_s0 + $0x80] sm:$0xff]   ;;  %v1139_v19 = vld [vmem:[%s1336_s0 + $0x88] sm:$0xff]   ;;  %v1140_v20 = vld [vmem:[%s1336_s0 + $0x30] sm:$0xff]  }
   0x8   :  { %1044 = vmatprep.subr.bf16.mxu0 %v1122_v2  ;;  %1106 = vmatprep.subr.bf16.mxu1 %v1122_v2  ;;  %v1141_v21 = vld [vmem:[%s1336_s0 + $0x90] sm:$0xff]   ;;  %v1142_v22 = vld [vmem:[%s1336_s0 + $0x38] sm:$0xff]   ;;  %v1144_v24 = vld [vmem:[%s1336_s0 + $0x40] sm:$0xff]  }
   0x9   :  { %v1143_v23 = vld [vmem:[%s1336_s0 + $0x98] sm:$0xff]   ;;  %v1145_v25 = vld [vmem:[%s1336_s0 + $0xa0] sm:$0xff]   ;;  %v1146_v26 = vld [vmem:[%s1336_s0 + $0x48] sm:$0xff]  }
   0xa   :  { %v1147_v27 = vld [vmem:[%s1336_s0 + $0xa8] sm:$0xff]   ;;  %v1148_v28 = vld [vmem:[%s1336_s0 + $0x50] sm:$0xff]   ;;  %v1150_v30 = vld [vmem:[%s1336_s0 + $0x58] sm:$0xff]  }
   0xb   :  { %1045 = vmatpush3.bf16.msra.mxu0 %v1122_v2  ;;  %1114 = vmatpush3.bf16.msra.mxu1 %v1122_v2  ;;  %v1149_v29 = vld [vmem:[%s1336_s0 + $0xb0] sm:$0xff]   ;;  %v1151_v31 = vld [vmem:[%s1336_s0 + $0xb8] sm:$0xff]  }
   0xc   :  { %1046 = vmatprep.subr.bf16.mxu0 %v1123_v3  ;;  %1107 = vmatprep.subr.bf16.mxu1 %v1123_v3 }
   0xf   :  { %1047 = vmatpush3.bf16.msra.mxu0 %v1123_v3  ;;  %1115 = vmatpush3.bf16.msra.mxu1 %v1123_v3 }
  0x10   :  { %1048 = vmatprep.subr.bf16.mxu0 %v1124_v6  ;;  %1108 = vmatprep.subr.bf16.mxu1 %v1124_v6 }
  0x13   :  { %1049 = vmatpush3.bf16.msra.mxu0 %v1124_v6  ;;  %1116 = vmatpush3.bf16.msra.mxu1 %v1124_v6 }
  0x14   :  { %1050 = vmatprep.subr.bf16.mxu0 %v1125_v7  ;;  %1109 = vmatprep.subr.bf16.mxu1 %v1125_v7 }
  0x17   :  { %1051 = vmatpush3.bf16.msra.mxu0 %v1125_v7  ;;  %1117 = vmatpush3.bf16.msra.mxu1 %v1125_v7 }
  0x18   :  { %1052 = vmatprep.subr.bf16.mxu0 %v1126_v8  ;;  %1110 = vmatprep.subr.bf16.mxu1 %v1126_v8 }
  0x1b   :  { %1053 = vmatpush3.bf16.msra.mxu0 %v1126_v8  ;;  %1118 = vmatpush3.bf16.msra.mxu1 %v1126_v8 }
  0x1c   :  { %1054 = vmatprep.subr.bf16.mxu0 %v1127_v9  ;;  %1111 = vmatprep.subr.bf16.mxu1 %v1127_v9 }
  0x1f   :  { %1055 = vmatpush3.bf16.msra.mxu0 %v1127_v9  ;;  %1119 = vmatpush3.bf16.msra.mxu1 %v1127_v9 }
  0x22   :  { %1057 = vmatmul.mubr.bf16.vlgmr.msra.gmra.mxu0 %v1130_v10  ;;  %1081 = vmatmul.mubr.bf16.vlgmr.msra.gmra.mxu1 %v1131_v11 }
  0x23   :  { %1060 = vmatprep.mubr.bf16.mxu0 %v1132_v12  ;;  %1084 = vmatprep.mubr.bf16.mxu1 %v1133_v13 }
  0x2a   :  { %1061 = vmatmul.mubr.bf16.gmra.mxu0 %v1134_v14  ;;  %1085 = vmatmul.mubr.bf16.gmra.mxu1 %v1135_v15 }
  0x2b   :  { %1064 = vmatprep.mubr.bf16.mxu0 %v1136_v16  ;;  %1088 = vmatprep.mubr.bf16.mxu1 %v1137_v17 }
  0x32   :  { %1065 = vmatmul.mubr.bf16.gmra.mxu0 %v1138_v18  ;;  %1089 = vmatmul.mubr.bf16.gmra.mxu1 %v1139_v19 }
  0x33   :  { %1068 = vmatprep.mubr.bf16.mxu0 %v1140_v20  ;;  %1092 = vmatprep.mubr.bf16.mxu1 %v1141_v21 }
  0x3a   :  { %1069 = vmatmul.mubr.bf16.gmra.mxu0 %v1142_v22  ;;  %1093 = vmatmul.mubr.bf16.gmra.mxu1 %v1143_v23 }
  0x3b   :  { %1072 = vmatprep.mubr.bf16.mxu0 %v1144_v24  ;;  %1096 = vmatprep.mubr.bf16.mxu1 %v1145_v25 }
  0x42   :  { %1073 = vmatmul.mubr.bf16.gmra.mxu0 %v1146_v26  ;;  %1097 = vmatmul.mubr.bf16.gmra.mxu1 %v1147_v27 }
  0x43   :  { %1076 = vmatprep.mubr.bf16.mxu0 %v1148_v28  ;;  %1100 = vmatprep.mubr.bf16.mxu1 %v1149_v29 }
  0x4a   :  { %1077 = vmatmul.mubr.bf16.gmra.mxu0 %v1150_v30  ;;  %1101 = vmatmul.mubr.bf16.gmra.mxu1 %v1151_v31 }
  0xe2   :  { %v1058_v32 = vpop.f32.mrf.mxu0  ;;  %v1082_v33 = vpop.f32.mrf.mxu1 }
  0xe4   :  { %v302_v34 = vpop.f32.mrf.mxu0  ;;  %v398_v35 = vpop.f32.mrf.mxu1 }
  0xe6   :  { %v1059_v36 = vpop.f32.mrf.mxu0  ;;  %v1083_v37 = vpop.f32.mrf.mxu1 }
  0xe7   :  { %v873_v38 = vpack.c.bf16 %v1059_v36, %v1058_v32  ;;  %v933_v39 = vpack.c.bf16 %v1083_v37, %v1082_v33 }
  0xe8   :  { %v305_v40 = vpop.f32.mrf.mxu0  ;;  %v401_v41 = vpop.f32.mrf.mxu1 }
  0xe9   :  { %985 = vst [vmem:[%s1337_s2 + $0x8] sm:$0xff] %v873_v38   ;;  %997 = vst [vmem:[%s1337_s2 + $0x68] sm:$0xff] %v933_v39   ;;  %v868_v42 = vpack.c.bf16 %v305_v40, %v302_v34  ;;  %v928_v43 = vpack.c.bf16 %v401_v41, %v398_v35 }
  0xea   :  { %v1062_v44 = vpop.f32.mrf.mxu0  ;;  %v1086_v45 = vpop.f32.mrf.mxu1 }
  0xeb   :  { %869 = vst [vmem:[%s1337_s2] sm:$0xff] %v868_v42   ;;  %996 = vst [vmem:[%s1337_s2 + $0x60] sm:$0xff] %v928_v43  }
  0xec   :  { %v318_v46 = vpop.f32.mrf.mxu0  ;;  %v414_v47 = vpop.f32.mrf.mxu1 }
  0xee   :  { %v1063_v48 = vpop.f32.mrf.mxu0  ;;  %v1087_v49 = vpop.f32.mrf.mxu1 }
  0xef   :  { %v883_v50 = vpack.c.bf16 %v1063_v48, %v1062_v44  ;;  %v943_v51 = vpack.c.bf16 %v1087_v49, %v1086_v45 }
  0xf0   :  { %v321_v52 = vpop.f32.mrf.mxu0  ;;  %v417_v53 = vpop.f32.mrf.mxu1 }
  0xf1   :  { %987 = vst [vmem:[%s1337_s2 + $0x18] sm:$0xff] %v883_v50   ;;  %999 = vst [vmem:[%s1337_s2 + $0x78] sm:$0xff] %v943_v51   ;;  %v878_v54 = vpack.c.bf16 %v321_v52, %v318_v46  ;;  %v938_v55 = vpack.c.bf16 %v417_v53, %v414_v47 }
  0xf2   :  { %v1066_v56 = vpop.f32.mrf.mxu0  ;;  %v1090_v57 = vpop.f32.mrf.mxu1 }
  0xf3   :  { %986 = vst [vmem:[%s1337_s2 + $0x10] sm:$0xff] %v878_v54   ;;  %998 = vst [vmem:[%s1337_s2 + $0x70] sm:$0xff] %v938_v55  }
  0xf4   :  { %v334_v58 = vpop.f32.mrf.mxu0  ;;  %v430_v59 = vpop.f32.mrf.mxu1 }
  0xf6   :  { %v1067_v60 = vpop.f32.mrf.mxu0  ;;  %v1091_v61 = vpop.f32.mrf.mxu1 }
  0xf7   :  { %v893_v62 = vpack.c.bf16 %v1067_v60, %v1066_v56  ;;  %v953_v63 = vpack.c.bf16 %v1091_v61, %v1090_v57 }
  0xf8   :  { %v337_v0 = vpop.f32.mrf.mxu0  ;;  %v433_v1 = vpop.f32.mrf.mxu1 }
  0xf9   :  { %989 = vst [vmem:[%s1337_s2 + $0x28] sm:$0xff] %v893_v62   ;;  %1001 = vst [vmem:[%s1337_s2 + $0x88] sm:$0xff] %v953_v63   ;;  %v888_v2 = vpack.c.bf16 %v337_v0, %v334_v58  ;;  %v948_v3 = vpack.c.bf16 %v433_v1, %v430_v59 }
  0xfa   :  { %v1070_v4 = vpop.f32.mrf.mxu0  ;;  %v1094_v5 = vpop.f32.mrf.mxu1 }
  0xfb   :  { %988 = vst [vmem:[%s1337_s2 + $0x20] sm:$0xff] %v888_v2   ;;  %1000 = vst [vmem:[%s1337_s2 + $0x80] sm:$0xff] %v948_v3  }
  0xfc   :  { %v350_v6 = vpop.f32.mrf.mxu0  ;;  %v446_v7 = vpop.f32.mrf.mxu1 }
  0xfe   :  { %v1071_v8 = vpop.f32.mrf.mxu0  ;;  %v1095_v9 = vpop.f32.mrf.mxu1 }
  0xff   :  { %v903_v10 = vpack.c.bf16 %v1071_v8, %v1070_v4  ;;  %v963_v11 = vpack.c.bf16 %v1095_v9, %v1094_v5 }
 0x100   :  { %v353_v12 = vpop.f32.mrf.mxu0  ;;  %v449_v13 = vpop.f32.mrf.mxu1 }
 0x101   :  { %991 = vst [vmem:[%s1337_s2 + $0x38] sm:$0xff] %v903_v10   ;;  %1003 = vst [vmem:[%s1337_s2 + $0x98] sm:$0xff] %v963_v11   ;;  %v898_v14 = vpack.c.bf16 %v353_v12, %v350_v6  ;;  %v958_v15 = vpack.c.bf16 %v449_v13, %v446_v7 }
 0x102   :  { %v1074_v16 = vpop.f32.mrf.mxu0  ;;  %v1098_v17 = vpop.f32.mrf.mxu1 }
 0x103   :  { %990 = vst [vmem:[%s1337_s2 + $0x30] sm:$0xff] %v898_v14   ;;  %1002 = vst [vmem:[%s1337_s2 + $0x90] sm:$0xff] %v958_v15  }
 0x104   :  { %v366_v18 = vpop.f32.mrf.mxu0  ;;  %v462_v19 = vpop.f32.mrf.mxu1 }
 0x106   :  { %v1075_v20 = vpop.f32.mrf.mxu0  ;;  %v1099_v21 = vpop.f32.mrf.mxu1 }
 0x107   :  { %v913_v22 = vpack.c.bf16 %v1075_v20, %v1074_v16  ;;  %v973_v23 = vpack.c.bf16 %v1099_v21, %v1098_v17 }
 0x108   :  { %v369_v24 = vpop.f32.mrf.mxu0  ;;  %v465_v25 = vpop.f32.mrf.mxu1 }
 0x109   :  { %993 = vst [vmem:[%s1337_s2 + $0x48] sm:$0xff] %v913_v22   ;;  %1005 = vst [vmem:[%s1337_s2 + $0xa8] sm:$0xff] %v973_v23   ;;  %v908_v26 = vpack.c.bf16 %v369_v24, %v366_v18  ;;  %v968_v27 = vpack.c.bf16 %v465_v25, %v462_v19 }
 0x10a   :  { %v1078_v28 = vpop.f32.mrf.mxu0  ;;  %v1102_v29 = vpop.f32.mrf.mxu1 }
 0x10b   :  { %992 = vst [vmem:[%s1337_s2 + $0x40] sm:$0xff] %v908_v26   ;;  %1004 = vst [vmem:[%s1337_s2 + $0xa0] sm:$0xff] %v968_v27  }
 0x10c   :  { %v382_v30 = vpop.f32.mrf.mxu0  ;;  %v478_v31 = vpop.f32.mrf.mxu1 }
 0x10e   :  { %v1079_v32 = vpop.f32.mrf.mxu0  ;;  %v1103_v33 = vpop.f32.mrf.mxu1 }
 0x10f   :  { %v923_v34 = vpack.c.bf16 %v1079_v32, %v1078_v28  ;;  %v983_v35 = vpack.c.bf16 %v1103_v33, %v1102_v29 }
 0x110   :  { %v385_v36 = vpop.f32.mrf.mxu0  ;;  %v481_v37 = vpop.f32.mrf.mxu1 }
 0x111   :  { %995 = vst [vmem:[%s1337_s2 + $0x58] sm:$0xff] %v923_v34   ;;  %1007 = vst [vmem:[%s1337_s2 + $0xb8] sm:$0xff] %v983_v35   ;;  %v918_v38 = vpack.c.bf16 %v385_v36, %v382_v30  ;;  %v978_v39 = vpack.c.bf16 %v481_v37, %v478_v31 }
 0x113   :  { %994 = vst [vmem:[%s1337_s2 + $0x50] sm:$0xff] %v918_v38   ;;  %1006 = vst [vmem:[%s1337_s2 + $0xb0] sm:$0xff] %v978_v39  }

// kernel: gcn_forward.5
= control target key start
LH: loop header
LB: loop body
LE: loop exit
PB: predicated region body
PF: predicated region fallthrough
CT: control target
= control target key end

     0   :  { %s1878_s12 = smov 0   ;;  %s1880_s13 = smov 0   ;;  %s2374_s0 = inlined_call_operand.vmem [shape: bf16[384,384], index: 0, kind: input, shape index: {}]   ;;  %s2375_s1 = inlined_call_operand.vmem [shape: bf16[384,128], index: 1, kind: input, shape index: {}]   ;;  %s2376_s2 = inlined_call_operand.vmem [shape: f32[1,128], index: 2, kind: input, shape index: {}]   ;;  %s2377_s3 = inlined_call_operand.vmem [shape: f32[384,128], index: 3, kind: output, shape index: {}]  }
   0x1   :  { %s1882_s14 = smov 0  }
   0x2 LB: > { %s25_s15 = sadd.s32 1, %s1852_s13  ;;  %p1427_p0 = scmp.ge.s32.totalorder %s1856_s14, 1  ;;  %s1856_s14 = sphi %s1882_s14, %s13_s14   ;;  %s1852_s13 = sphi %s1880_s13, %s2379_s13   ;;  %s1848_s12 = sphi %s1878_s12, %s2378_s12  }
   0x3   : > { %p27_p1 = scmp.ge.s32.totalorder %s25_s15, 2  ;;  %p158_p2 = scmp.lt.s32.totalorder %s1856_s14, 3 }
   0x5   : > { %s2381_s15 = smov (%p27_p1, %s25_s15), 0  ;;  %p159_p3 = pnand %p1427_p0, %p158_p2 }
   0x6   : > { %s187_s30 = smul.u32 (!%p159_p3), 24, %s1848_s12 }
   0x7   : > { %162 = sbr.rel (%p159_p3) target bundleno = 651 (0x28b), region = 32 }
   0x8   : > { %p189_p4 = scmp.lt.s32.totalorder (!%p159_p3), %s187_s30, 47 }
   0xc   : > { %v1666_v0 = vld [vmem:[%s2375_s1 + $0x78] sm:$0xff]   ;;  %v1669_v3 = vld [vmem:[%s2375_s1 + $0x70] sm:$0xff]   ;;  %v1672_v6 = vld [vmem:[%s2375_s1 + $0x68] sm:$0xff]   ;;  %s2383_s30 = smov (!%p189_p4, %s187_s30), 47  ;;  %v1059_v60 = vlaneseq }
   0xd   : > { %v1667_v1 = vld [vmem:[%s2375_s1 + $0x38] sm:$0xff]   ;;  %1493 = vmatprep.subr.bf16.mxu0 %v1666_v0  ;;  %v1670_v4 = vld [vmem:[%s2375_s1 + $0x30] sm:$0xff]   ;;  %v1673_v7 = vld [vmem:[%s2375_s1 + $0x28] sm:$0xff]   ;;  %s1641_s27 = smul.u32 12, %s2383_s30  ;;  %s1429_s24 = sshll.u32 %s2383_s30, 3 }
   0xe   : > { %v1668_v2 = vld [vmem:[%s2375_s1 + $0xb8] sm:$0xff]   ;;  %1494 = vmatpush3.bf16.msra.mxu0 %v1667_v1  ;;  %v1671_v5 = vld [vmem:[%s2375_s1 + $0xb0] sm:$0xff]   ;;  %v1674_v8 = vld [vmem:[%s2375_s1 + $0xa8] sm:$0xff]   ;;  %v2015_v0 = vand.u32 127, %v1059_v60 }
   0xf   : > { %1601 = vmatprep.subr.bf16.mxu1 %v1668_v2  ;;  %1495 = vmatprep.subr.bf16.mxu0 %v1669_v3  ;;  %v1675_v9 = vld [vmem:[%s2375_s1 + $0x60] sm:$0xff]   ;;  %v1678_v12 = vld [vmem:[%s2375_s1 + $0x58] sm:$0xff]   ;;  %v1681_v15 = vld [vmem:[%s2375_s1 + $0x50] sm:$0xff]   ;;  %s1968_s12 = scalar_lea.vmem %s2374_s0, %s1641_s27  ;;  %s2315_s27 = scalar_lea.vmem %s2377_s3, %s1429_s24 }
  0x10   : > { %1602 = vmatpush3.bf16.msra.mxu1 %v1668_v2  ;;  %v1676_v10 = vld [vmem:[%s2375_s1 + $0x20] sm:$0xff]   ;;  %v1680_v13 = vld [vmem:[%s2375_s1 + $0x98] sm:$0xff]   ;;  %v1683_v16 = vld [vmem:[%s2375_s1 + $0x90] sm:$0xff]   ;;  %vm1061_vm0 = vcmp.lt.s32.totalorder %v2015_v0, 4 }
  0x11   : > { %1603 = vmatprep.subr.bf16.mxu1 %v1671_v5  ;;  %v1677_v11 = vld [vmem:[%s2375_s1 + $0xa0] sm:$0xff]   ;;  %v1679_v14 = vld [vmem:[%s2375_s1 + $0x18] sm:$0xff]   ;;  %v1682_v17 = vld [vmem:[%s2375_s1 + $0x10] sm:$0xff]  }
  0x12   : > { %1496 = vmatpush3.bf16.msra.mxu0 %v1670_v4  ;;  %v1684_v18 = vld [vmem:[%s2375_s1 + $0x48] sm:$0xff]   ;;  %v1687_v21 = vld [vmem:[%s2375_s1 + $0x40] sm:$0xff]   ;;  %v1702_v32 = vld [vmem:[%s1968_s12 + $0x50] ss:$12 sps:$4 sm:$0xff]  }
  0x13   : > { %1497 = vmatprep.subr.bf16.mxu0 %v1672_v6  ;;  %v1685_v19 = vld [vmem:[%s2375_s1 + $0x8] sm:$0xff]   ;;  %v1689_v22 = vld [vmem:[%s2375_s1 + $0x80] sm:$0xff]   ;;  %v1700_v34 = vld [vmem:[%s1968_s12 + $0x30] ss:$12 sps:$4 sm:$0xff]  }
  0x14   : > { %1604 = vmatpush3.bf16.msra.mxu1 %v1671_v5  ;;  %v1686_v20 = vld [vmem:[%s2375_s1 + $0x88] sm:$0xff]   ;;  %v1692_v23 = vld [vmem:[%s1968_s12 + $0x4] ss:$12 sps:$4 sm:$0xff]   ;;  %v1698_v31 = vld [vmem:[%s1968_s12 + $0x34] ss:$12 sps:$4 sm:$0xff]  }
  0x15   : > { %1605 = vmatprep.subr.bf16.mxu1 %v1674_v8  ;;  %v1693_v24 = vld [vmem:[%s1968_s12 + $0x8] ss:$12 sps:$4 sm:$0xff]   ;;  %v1688_v25 = vld [vmem:[%s2375_s1] sm:$0xff]   ;;  %727 = vmatprep.mubr.bf16.mxu0 %v1692_v23  ;;  %v1703_v35 = vld [vmem:[%s1968_s12 + $0x4c] ss:$12 sps:$4 sm:$0xff]  }
  0x16   : > { %1498 = vmatpush3.bf16.msra.mxu0 %v1673_v7  ;;  %1617 = vmatprep.mubr.bf16.mxu1 %v1693_v24  ;;  %v1690_v26 = vld [vmem:[%s1968_s12] ss:$12 sps:$4 sm:$0xff]   ;;  %v1695_v27 = vld [vmem:[%s1968_s12 + $0x1c] ss:$12 sps:$4 sm:$0xff]   ;;  %v1701_v29 = vld [vmem:[%s1968_s12 + $0x38] ss:$12 sps:$4 sm:$0xff]  }
  0x17   : > { %1499 = vmatprep.subr.bf16.mxu0 %v1675_v9  ;;  %v1694_v28 = vld [vmem:[%s1968_s12 + $0x20] ss:$12 sps:$4 sm:$0xff]   ;;  %v1697_v30 = vld [vmem:[%s1968_s12 + $0x18] ss:$12 sps:$4 sm:$0xff]   ;;  %v1709_v33 = vld [vmem:[%s1968_s12 + $0x68] ss:$12 sps:$4 sm:$0xff]  }
  0x18   : > { %1606 = vmatpush3.bf16.msra.mxu1 %v1674_v8  ;;  %v1710_v36 = vld [vmem:[%s1968_s12 + $0x80] ss:$12 sps:$4 sm:$0xff]   ;;  %v1717_v37 = vld [vmem:[%s1968_s12 + $0x98] ss:$12 sps:$4 sm:$0xff]   ;;  %v1705_v38 = vld [vmem:[%s1968_s12 + $0x48] ss:$12 sps:$4 sm:$0xff]  }
  0x19   : > { %1607 = vmatprep.subr.bf16.mxu1 %v1677_v11  ;;  %v1706_v39 = vld [vmem:[%s1968_s12 + $0x64] ss:$12 sps:$4 sm:$0xff]   ;;  %v1725_v41 = vld [vmem:[%s1968_s12 + $0xc8] ss:$12 sps:$4 sm:$0xff]   ;;  %v1708_v42 = vld [vmem:[%s1968_s12 + $0x60] ss:$12 sps:$4 sm:$0xff]  }
  0x1a   : > { %1500 = vmatpush3.bf16.msra.mxu0 %v1676_v10  ;;  %v1718_v40 = vld [vmem:[%s1968_s12 + $0xb0] ss:$12 sps:$4 sm:$0xff]   ;;  %v1726_v44 = vld [vmem:[%s1968_s12 + $0xe0] ss:$12 sps:$4 sm:$0xff]   ;;  %v1732_v45 = vld [vmem:[%s1968_s12 + $0xf8] ss:$12 sps:$4 sm:$0xff]  }
  0x1b   : > { %1501 = vmatprep.subr.bf16.mxu0 %v1678_v12  ;;  %v1711_v43 = vld [vmem:[%s1968_s12 + $0x7c] ss:$12 sps:$4 sm:$0xff]   ;;  %v1713_v46 = vld [vmem:[%s1968_s12 + $0x78] ss:$12 sps:$4 sm:$0xff]   ;;  %v1714_v47 = vld [vmem:[%s1968_s12 + $0x94] ss:$12 sps:$4 sm:$0xff]  }
  0x1c   : > { %1608 = vmatpush3.bf16.msra.mxu1 %v1677_v11  ;;  %v1734_v48 = vld [vmem:[%s1968_s12 + $0x110] ss:$12 sps:$4 sm:$0xff]   ;;  %v1719_v50 = vld [vmem:[%s1968_s12 + $0xac] ss:$12 sps:$4 sm:$0xff]   ;;  %v1721_v51 = vld [vmem:[%s1968_s12 + $0xa8] ss:$12 sps:$4 sm:$0xff]  }
  0x1d   : > { %1609 = vmatprep.subr.bf16.mxu1 %v1680_v13  ;;  %v1716_v49 = vld [vmem:[%s1968_s12 + $0x90] ss:$12 sps:$4 sm:$0xff]   ;;  %v1724_v53 = vld [vmem:[%s1968_s12 + $0xc0] ss:$12 sps:$4 sm:$0xff]   ;;  %v1729_v55 = vld [vmem:[%s1968_s12 + $0xd8] ss:$12 sps:$4 sm:$0xff]  }
  0x1e   : > { %1502 = vmatpush3.bf16.msra.mxu0 %v1679_v14  ;;  %v1722_v52 = vld [vmem:[%s1968_s12 + $0xc4] ss:$12 sps:$4 sm:$0xff]   ;;  %v1727_v54 = vld [vmem:[%s1968_s12 + $0xdc] ss:$12 sps:$4 sm:$0xff]   ;;  %v1730_v56 = vld [vmem:[%s1968_s12 + $0xf4] ss:$12 sps:$4 sm:$0xff]  }
  0x1f   : > { %1503 = vmatprep.subr.bf16.mxu0 %v1681_v15  ;;  %v1733_v57 = vld [vmem:[%s1968_s12 + $0xf0] ss:$12 sps:$4 sm:$0xff]   ;;  %v1735_v58 = vld [vmem:[%s1968_s12 + $0x10c] ss:$12 sps:$4 sm:$0xff]   ;;  %v1737_v59 = vld [vmem:[%s1968_s12 + $0x108] ss:$12 sps:$4 sm:$0xff]  }
  0x20   : > { %1610 = vmatpush3.bf16.msra.mxu1 %v1680_v13  ;;  %v2020_v4 = vld [vmem:[%s2376_s2] ss:$0 sm:$0xff] }
  0x21   : > { %1611 = vmatprep.subr.bf16.mxu1 %v1683_v16 }
  0x22   : > { %1504 = vmatpush3.bf16.msra.mxu0 %v1682_v17 }
  0x23   : > { %1505 = vmatprep.subr.bf16.mxu0 %v1684_v18 }
  0x24   : > { %1612 = vmatpush3.bf16.msra.mxu1 %v1683_v16 }
  0x25   : > { %1613 = vmatprep.subr.bf16.mxu1 %v1686_v20 }
  0x26   : > { %1506 = vmatpush3.bf16.msra.mxu0 %v1685_v19 }
  0x27   : > { %1507 = vmatprep.subr.bf16.mxu0 %v1687_v21 }
  0x28   : > { %1614 = vmatpush3.bf16.msra.mxu1 %v1686_v20 }
  0x29   : > { %1615 = vmatprep.subr.bf16.mxu1 %v1689_v22 }
  0x2a   : > { %1508 = vmatpush3.bf16.msra.mxu0 %v1688_v25 }
  0x2c   : > { %1616 = vmatpush3.bf16.msra.mxu1 %v1689_v22 }
  0x2d   : > { %728 = vmatmul.mubr.bf16.vlgmr.msra.gmra.mxu0 %v1690_v26 }
  0x2e   : > { %735 = vmatprep.mubr.bf16.mxu0 %v1695_v27 }
  0x2f   : > { %1618 = vmatmul.mubr.bf16.vlgmr.msra.gmra.mxu1 %v1694_v28 }
  0x30   : > { %1621 = vmatprep.mubr.bf16.mxu1 %v1701_v29 }
  0x35   : > { %736 = vmatmul.mubr.bf16.gmra.mxu0 %v1697_v30 }
  0x36   : > { %743 = vmatprep.mubr.bf16.mxu0 %v1698_v31 }
  0x37   : > { %1622 = vmatmul.mubr.bf16.gmra.mxu1 %v1702_v32 }
  0x38   : > { %1625 = vmatprep.mubr.bf16.mxu1 %v1709_v33 }
  0x3d   : > { %744 = vmatmul.mubr.bf16.gmra.mxu0 %v1700_v34 }
  0x3e   : > { %751 = vmatprep.mubr.bf16.mxu0 %v1703_v35 }
  0x3f   : > { %1626 = vmatmul.mubr.bf16.gmra.mxu1 %v1710_v36 }
  0x40   : > { %1629 = vmatprep.mubr.bf16.mxu1 %v1717_v37 }
  0x45   : > { %752 = vmatmul.mubr.bf16.gmra.mxu0 %v1705_v38 }
  0x46   : > { %759 = vmatprep.mubr.bf16.mxu0 %v1706_v39 }
  0x47   : > { %1630 = vmatmul.mubr.bf16.gmra.mxu1 %v1718_v40 }
  0x48   : > { %1633 = vmatprep.mubr.bf16.mxu1 %v1725_v41 }
  0x4d   : > { %760 = vmatmul.mubr.bf16.gmra.mxu0 %v1708_v42 }
  0x4e   : > { %767 = vmatprep.mubr.bf16.mxu0 %v1711_v43 }
  0x4f   : > { %1634 = vmatmul.mubr.bf16.gmra.mxu1 %v1726_v44 }
  0x50   : > { %1637 = vmatprep.mubr.bf16.mxu1 %v1732_v45 }
  0x55   : > { %768 = vmatmul.mubr.bf16.gmra.mxu0 %v1713_v46 }
  0x56   : > { %775 = vmatprep.mubr.bf16.mxu0 %v1714_v47 }
  0x57   : > { %1638 = vmatmul.mubr.bf16.gmra.mxu1 %v1734_v48 }
  0x5d   : > { %776 = vmatmul.mubr.bf16.gmra.mxu0 %v1716_v49 }
  0x5e   : > { %783 = vmatprep.mubr.bf16.mxu0 %v1719_v50 }
  0x65   : > { %784 = vmatmul.mubr.bf16.gmra.mxu0 %v1721_v51 }
  0x66   : > { %791 = vmatprep.mubr.bf16.mxu0 %v1722_v52 }
  0x6d   : > { %792 = vmatmul.mubr.bf16.gmra.mxu0 %v1724_v53 }
  0x6e   : > { %799 = vmatprep.mubr.bf16.mxu0 %v1727_v54 }
  0x75   : > { %800 = vmatmul.mubr.bf16.gmra.mxu0 %v1729_v55 }
  0x76   : > { %807 = vmatprep.mubr.bf16.mxu0 %v1730_v56 }
  0x7d   : > { %808 = vmatmul.mubr.bf16.gmra.mxu0 %v1733_v57 }
  0x7e   : > { %815 = vmatprep.mubr.bf16.mxu0 %v1735_v58 }
  0x85   : > { %816 = vmatmul.mubr.bf16.gmra.mxu0 %v1737_v59 }
  0xed   : > { %v1509_v61 = vpop.f32.mrf.mxu0 }
  0xef   : > { %v1510_v62 = vpop.f32.mrf.mxu0  ;;  %v1619_v63 = vpop.f32.mrf.mxu1 }
  0xf0   : > { %v1511_v1 = vadd.f32 %v1510_v62, %v1509_v61 }
  0xf1   : > { %v1512_v2 = vpop.f32.mrf.mxu0  ;;  %v858_v3 = vpop.f32.mrf.mxu1 }
  0xf2   : > { %v859_v5 = vadd.f32 %v1511_v1, %v858_v3 }
  0xf3   : > { %v1513_v6 = vpop.f32.mrf.mxu0  ;;  %v1620_v7 = vpop.f32.mrf.mxu1 }
  0xf4   : > { %v1514_v8 = vadd.f32 %v1513_v6, %v1512_v2  ;;  %v1035_v9 = vadd.f32 %v2020_v4, %v859_v5 }
  0xf5   : > { %v1515_v10 = vpop.f32.mrf.mxu0  ;;  %v861_v11 = vpop.f32.mrf.mxu1 }
  0xf6   : > { %v862_v12 = vadd.f32 %v1514_v8, %v861_v11  ;;  %v2026_v13 = vsel %vm1061_vm0, %v1035_v9, -inf }
  0xf7   : > { %v1516_v14 = vpop.f32.mrf.mxu0  ;;  %1086 = vmax.xlane.f32.xlu0 %v2026_v13  ;;  %v1623_v15 = vpop.f32.mrf.mxu1 }
  0xf8   : > { %v1517_v16 = vadd.f32 %v1516_v14, %v1515_v10  ;;  %v1036_v17 = vadd.f32 %v2020_v4, %v862_v12 }
  0xf9   : > { %v1518_v18 = vpop.f32.mrf.mxu0  ;;  %v874_v22 = vpop.f32.mrf.mxu1 }
  0xfa   : > { %v867_v19 = vadd.f32 %v1619_v63, %v1517_v16  ;;  %v2032_v20 = vsel %vm1061_vm0, %v1036_v17, -inf }
  0xfb   : > { %v1519_v21 = vpop.f32.mrf.mxu0  ;;  %1088 = vmax.xlane.f32.xlu0 %v2032_v20  ;;  %v1624_v29 = vpop.f32.mrf.mxu1 }
  0xfc   : > { %v1520_v23 = vadd.f32 %v1519_v21, %v1518_v18  ;;  %v1037_v24 = vadd.f32 %v2020_v4, %v867_v19 }
  0xfd   : > { %v1521_v25 = vpop.f32.mrf.mxu0  ;;  %v877_v36 = vpop.f32.mrf.mxu1 }
  0xfe   : > { %v870_v26 = vadd.f32 %v1620_v7, %v1520_v23  ;;  %v2038_v27 = vsel %vm1061_vm0, %v1037_v24, -inf }
  0xff   : > { %v1522_v28 = vpop.f32.mrf.mxu0  ;;  %1090 = vmax.xlane.f32.xlu1 %v2038_v27  ;;  %v1627_v43 = vpop.f32.mrf.mxu1 }
 0x100   : > { %v1523_v30 = vadd.f32 %v1522_v28, %v1521_v25  ;;  %v1038_v31 = vadd.f32 %v2020_v4, %v870_v26 }
 0x101   : > { %v1524_v32 = vpop.f32.mrf.mxu0  ;;  %v890_v50 = vpop.f32.mrf.mxu1 }
 0x102   : > { %v875_v33 = vadd.f32 %v1523_v30, %v874_v22  ;;  %v2044_v34 = vsel %vm1061_vm0, %v1038_v31, -inf }
 0x103   : > { %v1525_v35 = vpop.f32.mrf.mxu0  ;;  %1092 = vmax.xlane.f32.xlu1 %v2044_v34  ;;  %v1628_v57 = vpop.f32.mrf.mxu1 }
 0x104   : > { %v1526_v37 = vadd.f32 %v1525_v35, %v1524_v32  ;;  %v1039_v38 = vadd.f32 %v2020_v4, %v875_v33 }
 0x105   : > { %v1527_v39 = vpop.f32.mrf.mxu0  ;;  %v893_v1 = vpop.f32.mrf.mxu1 }
 0x106   : > { %v878_v40 = vadd.f32 %v1526_v37, %v877_v36  ;;  %v2050_v41 = vsel %vm1061_vm0, %v1039_v38, -inf }
 0x107   : > { %v1528_v42 = vpop.f32.mrf.mxu0  ;;  %1094 = vmax.xlane.f32.xlu0 %v2050_v41  ;;  %v1631_v9 = vpop.f32.mrf.mxu1 }
 0x108   : > { %v1529_v44 = vadd.f32 %v1528_v42, %v1527_v39  ;;  %v1040_v45 = vadd.f32 %v2020_v4, %v878_v40 }
 0x109   : > { %v1530_v46 = vpop.f32.mrf.mxu0  ;;  %v906_v17 = vpop.f32.mrf.mxu1 }
 0x10a   : > { %v883_v47 = vadd.f32 %v1623_v15, %v1529_v44  ;;  %v2056_v48 = vsel %vm1061_vm0, %v1040_v45, -inf }
 0x10b   : > { %v1531_v49 = vpop.f32.mrf.mxu0  ;;  %1096 = vmax.xlane.f32.xlu1 %v2056_v48  ;;  %v1632_v25 = vpop.f32.mrf.mxu1 }
 0x10c   : > { %v1532_v51 = vadd.f32 %v1531_v49, %v1530_v46  ;;  %v1041_v52 = vadd.f32 %v2020_v4, %v883_v47 }
 0x10d   : > { %v1533_v53 = vpop.f32.mrf.mxu0  ;;  %v909_v33 = vpop.f32.mrf.mxu1 }
 0x10e   : > { %v886_v54 = vadd.f32 %v1624_v29, %v1532_v51  ;;  %v2062_v55 = vsel %vm1061_vm0, %v1041_v52, -inf }
 0x10f   : > { %v1534_v56 = vpop.f32.mrf.mxu0  ;;  %1098 = vmax.xlane.f32.xlu0 %v2062_v55  ;;  %v1635_v42 = vpop.f32.mrf.mxu1 }
 0x110   : > { %v1535_v58 = vadd.f32 %v1534_v56, %v1533_v53  ;;  %v1042_v59 = vadd.f32 %v2020_v4, %v886_v54 }
 0x111   : > { %v1536_v60 = vpop.f32.mrf.mxu0 }
 0x112   : > { %v891_v61 = vadd.f32 %v1535_v58, %v890_v50  ;;  %v2068_v62 = vsel %vm1061_vm0, %v1042_v59, -inf  ;;  %v922_v50 = vpop.f32.mrf.mxu1 }
 0x113   : > { %v1537_v63 = vpop.f32.mrf.mxu0  ;;  %1100 = vmax.xlane.f32.xlu1 %v2068_v62 }
 0x114   : > { %v1538_v2 = vadd.f32 %v1537_v63, %v1536_v60  ;;  %v1043_v3 = vadd.f32 %v2020_v4, %v891_v61  ;;  %v1636_v58 = vpop.f32.mrf.mxu1 }
 0x115   : > { %v1539_v5 = vpop.f32.mrf.mxu0 }
 0x116   : > { %v894_v6 = vadd.f32 %v1538_v2, %v893_v1  ;;  %v2074_v7 = vsel %vm1061_vm0, %v1043_v3, -inf  ;;  %v925_v3 = vpop.f32.mrf.mxu1 }
 0x117   : > { %v1540_v8 = vpop.f32.mrf.mxu0  ;;  %1102 = vmax.xlane.f32.xlu0 %v2074_v7 }
 0x118   : > { %v1541_v10 = vadd.f32 %v1540_v8, %v1539_v5  ;;  %v1044_v11 = vadd.f32 %v2020_v4, %v894_v6 }
 0x119   : > { %v1542_v12 = vpop.f32.mrf.mxu0 }
 0x11a   : > { %v899_v14 = vadd.f32 %v1627_v43, %v1541_v10  ;;  %v2080_v15 = vsel %vm1061_vm0, %v1044_v11, -inf }
 0x11b   : > { %v1543_v16 = vpop.f32.mrf.mxu0  ;;  %1104 = vmax.xlane.f32.xlu1 %v2080_v15 }
 0x11c   : > { %v1544_v18 = vadd.f32 %v1543_v16, %v1542_v12  ;;  %v1045_v19 = vadd.f32 %v2020_v4, %v899_v14 }
 0x11d   : > { %v1545_v21 = vpop.f32.mrf.mxu0 }
 0x11e   : > { %v902_v22 = vadd.f32 %v1628_v57, %v1544_v18  ;;  %v2086_v23 = vsel %vm1061_vm0, %v1045_v19, -inf }
 0x11f   : > { %v1546_v24 = vpop.f32.mrf.mxu0  ;;  %1106 = vmax.xlane.f32.xlu0 %v2086_v23 }
 0x120   : > { %v1547_v26 = vadd.f32 %v1546_v24, %v1545_v21  ;;  %v1046_v28 = vadd.f32 %v2020_v4, %v902_v22 }
 0x121   : > { %v1548_v29 = vpop.f32.mrf.mxu0 }
 0x122   : > { %v907_v30 = vadd.f32 %v1547_v26, %v906_v17  ;;  %v2092_v31 = vsel %vm1061_vm0, %v1046_v28, -inf  ;;  %v1639_v17 = vpop.f32.mrf.mxu1 }
 0x123   : > { %v1549_v32 = vpop.f32.mrf.mxu0  ;;  %1108 = vmax.xlane.f32.xlu1 %v2092_v31 }
 0x124   : > { %v1550_v35 = vadd.f32 %v1549_v32, %v1548_v29  ;;  %v1047_v36 = vadd.f32 %v2020_v4, %v907_v30  ;;  %v938_v26 = vpop.f32.mrf.mxu1 }
 0x125   : > { %v1551_v37 = vpop.f32.mrf.mxu0 }
 0x126   : > { %v910_v38 = vadd.f32 %v1550_v35, %v909_v33  ;;  %v2098_v39 = vsel %vm1061_vm0, %v1047_v36, -inf  ;;  %v1640_v36 = vpop.f32.mrf.mxu1 }
 0x127   : > { %v1552_v40 = vpop.f32.mrf.mxu0  ;;  %1110 = vmax.xlane.f32.xlu0 %v2098_v39 }
 0x128   : > { %v1553_v43 = vadd.f32 %v1552_v40, %v1551_v37  ;;  %v1048_v44 = vadd.f32 %v2020_v4, %v910_v38 }
 0x129   : > { %v1554_v45 = vpop.f32.mrf.mxu0 }
 0x12a   : > { %v915_v46 = vadd.f32 %v1631_v9, %v1553_v43  ;;  %v2104_v47 = vsel %vm1061_vm0, %v1048_v44, -inf  ;;  %v941_v44 = vpop.f32.mrf.mxu1 }
 0x12b   : > { %v1555_v49 = vpop.f32.mrf.mxu0  ;;  %1112 = vmax.xlane.f32.xlu1 %v2104_v47 }
 0x12c   : > { %v1556_v51 = vadd.f32 %v1555_v49, %v1554_v45  ;;  %v1049_v52 = vadd.f32 %v2020_v4, %v915_v46 }
 0x12d   : > { %v1557_v53 = vpop.f32.mrf.mxu0 }
 0x12e   : > { %v918_v54 = vadd.f32 %v1632_v25, %v1556_v51  ;;  %v2110_v56 = vsel %vm1061_vm0, %v1049_v52, -inf }
 0x12f   : > { %v1558_v57 = vpop.f32.mrf.mxu0  ;;  %1114 = vmax.xlane.f32.xlu0 %v2110_v56 }
 0x130   : > { %v1559_v59 = vadd.f32 %v1558_v57, %v1557_v53  ;;  %v1050_v60 = vadd.f32 %v2020_v4, %v918_v54 }
 0x131   : > { %v1560_v61 = vpop.f32.mrf.mxu0 }
 0x132   : > { %v923_v63 = vadd.f32 %v1559_v59, %v922_v50  ;;  %v2116_v1 = vsel %vm1061_vm0, %v1050_v60, -inf }
 0x133   : > { %v1561_v2 = vpop.f32.mrf.mxu0  ;;  %1116 = vmax.xlane.f32.xlu1 %v2116_v1 }
 0x134   : > { %v1562_v5 = vadd.f32 %v1561_v2, %v1560_v61  ;;  %v1051_v6 = vadd.f32 %v2020_v4, %v923_v63 }
 0x135   : > { %v1563_v8 = vpop.f32.mrf.mxu0 }
 0x136   : > { %v926_v9 = vadd.f32 %v1562_v5, %v925_v3  ;;  %v2122_v10 = vsel %vm1061_vm0, %v1051_v6, -inf }
 0x137   : > { %v1564_v11 = vpop.f32.mrf.mxu0  ;;  %1118 = vmax.xlane.f32.xlu0 %v2122_v10 }
 0x138   : > { %v1565_v12 = vadd.f32 %v1564_v11, %v1563_v8  ;;  %v1052_v14 = vadd.f32 %v2020_v4, %v926_v9 }
 0x139   : > { %v1566_v16 = vpop.f32.mrf.mxu0 }
 0x13a   : > { %v931_v18 = vadd.f32 %v1635_v42, %v1565_v12  ;;  %v2128_v19 = vsel %vm1061_vm0, %v1052_v14, -inf }
 0x13b   : > { %v1567_v21 = vpop.f32.mrf.mxu0  ;;  %1120 = vmax.xlane.f32.xlu1 %v2128_v19 }
 0x13c   : > { %v1568_v22 = vadd.f32 %v1567_v21, %v1566_v16  ;;  %v1053_v24 = vadd.f32 %v2020_v4, %v931_v18 }
 0x13d   : > { %v1569_v25 = vpop.f32.mrf.mxu0 }
 0x13e   : > { %v934_v28 = vadd.f32 %v1636_v58, %v1568_v22  ;;  %v2134_v29 = vsel %vm1061_vm0, %v1053_v24, -inf }
 0x13f   : > { %v1570_v30 = vpop.f32.mrf.mxu0  ;;  %1122 = vmax.xlane.f32.xlu0 %v2134_v29 }
 0x140   : > { %v1571_v32 = vadd.f32 %v1570_v30, %v1569_v25  ;;  %v1054_v33 = vadd.f32 %v2020_v4, %v934_v28 }
 0x141   : > { %v1572_v35 = vpop.f32.mrf.mxu0 }
 0x142   : > { %v939_v37 = vadd.f32 %v1571_v32, %v938_v26  ;;  %v2140_v38 = vsel %vm1061_vm0, %v1054_v33, -inf }
 0x143   : > { %v1573_v40 = vpop.f32.mrf.mxu0  ;;  %1124 = vmax.xlane.f32.xlu1 %v2140_v38 }
 0x144   : > { %v1574_v42 = vadd.f32 %v1573_v40, %v1572_v35  ;;  %v1055_v43 = vadd.f32 %v2020_v4, %v939_v37 }
 0x145   : > { %v1575_v45 = vpop.f32.mrf.mxu0 }
 0x146   : > { %v942_v46 = vadd.f32 %v1574_v42, %v941_v44  ;;  %v2146_v49 = vsel %vm1061_vm0, %v1055_v43, -inf }
 0x147   : > { %v1576_v50 = vpop.f32.mrf.mxu0  ;;  %1126 = vmax.xlane.f32.xlu0 %v2146_v49 }
 0x148   : > { %v1577_v51 = vadd.f32 %v1576_v50, %v1575_v45  ;;  %v1056_v52 = vadd.f32 %v2020_v4, %v942_v46 }
 0x149   : > { %v1578_v53 = vpop.f32.mrf.mxu0 }
 0x14a   : > { %v947_v54 = vadd.f32 %v1639_v17, %v1577_v51  ;;  %v2152_v57 = vsel %vm1061_vm0, %v1056_v52, -inf }
 0x14b   : > { %v1579_v58 = vpop.f32.mrf.mxu0  ;;  %1128 = vmax.xlane.f32.xlu1 %v2152_v57 }
 0x14c   : > { %v1580_v59 = vadd.f32 %v1579_v58, %v1578_v53  ;;  %v1057_v60 = vadd.f32 %v2020_v4, %v947_v54 }
 0x14e   : > { %v950_v61 = vadd.f32 %v1640_v36, %v1580_v59  ;;  %v2158_v63 = vsel %vm1061_vm0, %v1057_v60, -inf }
 0x14f   : > { %1130 = vmax.xlane.f32.xlu0 %v2158_v63 }
 0x150   : > { %v1058_v2 = vadd.f32 %v2020_v4, %v950_v61 }
 0x152   : > { %v2164_v3 = vsel %vm1061_vm0, %v1058_v2, -inf }
 0x153   : > { %1132 = vmax.xlane.f32.xlu1 %v2164_v3 }
 0x180   : > { %v1087_v5 = vpop.xlane.xlu0 %1086 }
 0x181   : > { %v1134_v6 = vsub.f32 %v2026_v13, %v1087_v5 }
 0x183   : > { %v1158_v8 = vmul.f32 1.442695, %v1134_v6 }
 0x184   : > { %v1089_v9 = vpop.xlane.xlu0 %1088 }
 0x185   : > { %1738 = vpow2.f32 %v1158_v8  ;;  %v1135_v11 = vsub.f32 %v2032_v20, %v1089_v9 }
 0x187   : > { %v1160_v12 = vmul.f32 1.442695, %v1135_v11 }
 0x188   : > { %v1091_v14 = vpop.xlane.xlu1 %1090 }
 0x189   : > { %1740 = vpow2.f32 %v1160_v12  ;;  %v1136_v16 = vsub.f32 %v2038_v27, %v1091_v14 }
 0x18b   : > { %v1162_v4 = vmul.f32 1.442695, %v1136_v16 }
 0x18c   : > { %v1093_v17 = vpop.xlane.xlu1 %1092 }
 0x18d   : > { %1742 = vpow2.f32 %v1162_v4  ;;  %v1137_v18 = vsub.f32 %v2044_v34, %v1093_v17 }
 0x18f   : > { %v1164_v21 = vmul.f32 1.442695, %v1137_v18 }
 0x190   : > { %v1095_v22 = vpop.xlane.xlu0 %1094 }
 0x191   : > { %1744 = vpow2.f32 %v1164_v21  ;;  %v1138_v13 = vsub.f32 %v2050_v41, %v1095_v22 }
 0x192   : > { %v1739_v24 = vpop.eup %1738 }
 0x193   : > { %v1166_v25 = vmul.f32 1.442695, %v1138_v13  ;;  %v2174_v20 = vsel %vm1061_vm0, %v1739_v24, 0.0 }
 0x194   : > { %v1097_v26 = vpop.xlane.xlu1 %1096  ;;  %1230 = vadd.xlane.f32.xlu0 %v2174_v20 }
 0x195   : > { %1746 = vpow2.f32 %v1166_v25  ;;  %v1139_v27 = vsub.f32 %v2056_v48, %v1097_v26 }
 0x196   : > { %v1741_v28 = vpop.eup %1740 }
 0x197   : > { %v1168_v30 = vmul.f32 1.442695, %v1139_v27  ;;  %v2180_v34 = vsel %vm1061_vm0, %v1741_v28, 0.0 }
 0x198   : > { %1232 = vadd.xlane.f32.xlu1 %v2180_v34  ;;  %v1099_v41 = vpop.xlane.xlu0 %1098 }
 0x199   : > { %1748 = vpow2.f32 %v1168_v30  ;;  %v1140_v32 = vsub.f32 %v2062_v55, %v1099_v41 }
 0x19a   : > { %v1743_v33 = vpop.eup %1742 }
 0x19b   : > { %v1170_v35 = vmul.f32 1.442695, %v1140_v32  ;;  %v2186_v36 = vsel %vm1061_vm0, %v1743_v33, 0.0 }
 0x19c   : > { %v1101_v37 = vpop.xlane.xlu1 %1100  ;;  %1234 = vadd.xlane.f32.xlu0 %v2186_v36 }
 0x19d   : > { %1750 = vpow2.f32 %v1170_v35  ;;  %v1141_v48 = vsub.f32 %v2068_v62, %v1101_v37 }
 0x19e   : > { %v1745_v40 = vpop.eup %1744 }
 0x19f   : > { %v1172_v42 = vmul.f32 1.442695, %v1141_v48  ;;  %v2192_v43 = vsel %vm1061_vm0, %v1745_v40, 0.0 }
 0x1a0   : > { %1236 = vadd.xlane.f32.xlu1 %v2192_v43  ;;  %v1103_v55 = vpop.xlane.xlu0 %1102 }
 0x1a1   : > { %1752 = vpow2.f32 %v1172_v42  ;;  %v1142_v44 = vsub.f32 %v2074_v7, %v1103_v55 }
 0x1a2   : > { %v1747_v45 = vpop.eup %1746 }
 0x1a3   : > { %v1174_v46 = vmul.f32 1.442695, %v1142_v44  ;;  %v2198_v50 = vsel %vm1061_vm0, %v1747_v45, 0.0 }
 0x1a4   : > { %v1105_v51 = vpop.xlane.xlu1 %1104  ;;  %1238 = vadd.xlane.f32.xlu0 %v2198_v50 }
 0x1a5   : > { %1754 = vpow2.f32 %v1174_v46  ;;  %v1143_v62 = vsub.f32 %v2080_v15, %v1105_v51 }
 0x1a6   : > { %v1749_v52 = vpop.eup %1748 }
 0x1a7   : > { %v1176_v53 = vmul.f32 1.442695, %v1143_v62  ;;  %v2204_v54 = vsel %vm1061_vm0, %v1749_v52, 0.0 }
 0x1a8   : > { %1240 = vadd.xlane.f32.xlu1 %v2204_v54  ;;  %v1107_v7 = vpop.xlane.xlu0 %1106 }
 0x1a9   : > { %1756 = vpow2.f32 %v1176_v53  ;;  %v1144_v58 = vsub.f32 %v2086_v23, %v1107_v7 }
 0x1aa   : > { %v1751_v59 = vpop.eup %1750 }
 0x1ab   : > { %v1178_v60 = vmul.f32 1.442695, %v1144_v58  ;;  %v2210_v61 = vsel %vm1061_vm0, %v1751_v59, 0.0 }
 0x1ac   : > { %v1109_v2 = vpop.xlane.xlu1 %1108  ;;  %1242 = vadd.xlane.f32.xlu0 %v2210_v61 }
 0x1ad   : > { %1758 = vpow2.f32 %v1178_v60  ;;  %v1145_v15 = vsub.f32 %v2092_v31, %v1109_v2 }
 0x1ae   : > { %v1753_v5 = vpop.eup %1752 }
 0x1af   : > { %v1180_v6 = vmul.f32 1.442695, %v1145_v15  ;;  %v2216_v8 = vsel %vm1061_vm0, %v1753_v5, 0.0 }
 0x1b0   : > { %1244 = vadd.xlane.f32.xlu1 %v2216_v8  ;;  %v1111_v23 = vpop.xlane.xlu0 %1110 }
 0x1b1   : > { %1760 = vpow2.f32 %v1180_v6  ;;  %v1146_v9 = vsub.f32 %v2098_v39, %v1111_v23 }
 0x1b2   : > { %v1755_v11 = vpop.eup %1754 }
 0x1b3   : > { %v1182_v12 = vmul.f32 1.442695, %v1146_v9  ;;  %v2222_v14 = vsel %vm1061_vm0, %v1755_v11, 0.0 }
 0x1b4   : > { %v1113_v16 = vpop.xlane.xlu1 %1112  ;;  %1246 = vadd.xlane.f32.xlu0 %v2222_v14 }
 0x1b5   : > { %1762 = vpow2.f32 %v1182_v12  ;;  %v1147_v31 = vsub.f32 %v2104_v47, %v1113_v16 }
 0x1b6   : > { %v1757_v4 = vpop.eup %1756 }
 0x1b7   : > { %v1184_v17 = vmul.f32 1.442695, %v1147_v31  ;;  %v2228_v18 = vsel %vm1061_vm0, %v1757_v4, 0.0 }
 0x1b8   : > { %1248 = vadd.xlane.f32.xlu1 %v2228_v18  ;;  %v1115_v39 = vpop.xlane.xlu0 %1114 }
 0x1b9   : > { %1764 = vpow2.f32 %v1184_v17  ;;  %v1148_v21 = vsub.f32 %v2110_v56, %v1115_v39 }
 0x1ba   : > { %v1759_v22 = vpop.eup %1758 }
 0x1bb   : > { %v1186_v13 = vmul.f32 1.442695, %v1148_v21  ;;  %v2234_v24 = vsel %vm1061_vm0, %v1759_v22, 0.0 }
 0x1bc   : > { %v1117_v25 = vpop.xlane.xlu1 %1116  ;;  %1250 = vadd.xlane.f32.xlu0 %v2234_v24 }
 0x1bd   : > { %1766 = vpow2.f32 %v1186_v13  ;;  %v1149_v47 = vsub.f32 %v2116_v1, %v1117_v25 }
 0x1be   : > { %v1761_v26 = vpop.eup %1760 }
 0x1bf   : > { %v1188_v27 = vmul.f32 1.442695, %v1149_v47  ;;  %v2240_v28 = vsel %vm1061_vm0, %v1761_v26, 0.0 }
 0x1c0   : > { %1252 = vadd.xlane.f32.xlu1 %v2240_v28  ;;  %v1119_v56 = vpop.xlane.xlu0 %1118 }
 0x1c1   : > { %1768 = vpow2.f32 %v1188_v27  ;;  %v1150_v30 = vsub.f32 %v2122_v10, %v1119_v56 }
 0x1c2   : > { %v1763_v41 = vpop.eup %1762 }
 0x1c3   : > { %v1190_v32 = vmul.f32 1.442695, %v1150_v30  ;;  %v2246_v33 = vsel %vm1061_vm0, %v1763_v41, 0.0 }
 0x1c4   : > { %v1121_v35 = vpop.xlane.xlu1 %1120  ;;  %1254 = vadd.xlane.f32.xlu0 %v2246_v33 }
 0x1c5   : > { %1770 = vpow2.f32 %v1190_v32  ;;  %v1151_v1 = vsub.f32 %v2128_v19, %v1121_v35 }
 0x1c6   : > { %v1765_v37 = vpop.eup %1764 }
 0x1c7   : > { %v1192_v48 = vmul.f32 1.442695, %v1151_v1  ;;  %v2252_v40 = vsel %vm1061_vm0, %v1765_v37, 0.0 }
 0x1c8   : > { %1256 = vadd.xlane.f32.xlu1 %v2252_v40  ;;  %v1123_v10 = vpop.xlane.xlu0 %1122 }
 0x1c9   : > { %1772 = vpow2.f32 %v1192_v48  ;;  %v1152_v42 = vsub.f32 %v2134_v29, %v1123_v10 }
 0x1ca   : > { %v1767_v55 = vpop.eup %1766 }
 0x1cb   : > { %v1194_v44 = vmul.f32 1.442695, %v1152_v42  ;;  %v2258_v45 = vsel %vm1061_vm0, %v1767_v55, 0.0 }
 0x1cc   : > { %v1125_v46 = vpop.xlane.xlu1 %1124  ;;  %1258 = vadd.xlane.f32.xlu0 %v2258_v45 }
 0x1cd   : > { %1774 = vpow2.f32 %v1194_v44  ;;  %v1153_v19 = vsub.f32 %v2140_v38, %v1125_v46 }
 0x1ce   : > { %v1769_v51 = vpop.eup %1768 }
 0x1cf   : > { %v1196_v62 = vmul.f32 1.442695, %v1153_v19  ;;  %v2264_v52 = vsel %vm1061_vm0, %v1769_v51, 0.0 }
 0x1d0   : > { %1260 = vadd.xlane.f32.xlu1 %v2264_v52  ;;  %v1127_v29 = vpop.xlane.xlu0 %1126 }
 0x1d1   : > { %1776 = vpow2.f32 %v1196_v62  ;;  %v1154_v53 = vsub.f32 %v2146_v49, %v1127_v29 }
 0x1d2   : > { %v1771_v7 = vpop.eup %1770 }
 0x1d3   : > { %v1198_v58 = vmul.f32 1.442695, %v1154_v53  ;;  %v2270_v59 = vsel %vm1061_vm0, %v1771_v7, 0.0 }
 0x1d4   : > { %v1129_v60 = vpop.xlane.xlu1 %1128  ;;  %1262 = vadd.xlane.f32.xlu0 %v2270_v59 }
 0x1d5   : > { %1778 = vpow2.f32 %v1198_v58  ;;  %v1155_v38 = vsub.f32 %v2152_v57, %v1129_v60 }
 0x1d6   : > { %v1773_v2 = vpop.eup %1772 }
 0x1d7   : > { %v1200_v15 = vmul.f32 1.442695, %v1155_v38  ;;  %v2276_v5 = vsel %vm1061_vm0, %v1773_v2, 0.0 }
 0x1d8   : > { %1264 = vadd.xlane.f32.xlu1 %v2276_v5  ;;  %v1131_v49 = vpop.xlane.xlu0 %1130 }
 0x1d9   : > { %1780 = vpow2.f32 %v1200_v15  ;;  %v1156_v6 = vsub.f32 %v2158_v63, %v1131_v49 }
 0x1da   : > { %v1775_v23 = vpop.eup %1774 }
 0x1db   : > { %v1202_v9 = vmul.f32 1.442695, %v1156_v6  ;;  %v2282_v11 = vsel %vm1061_vm0, %v1775_v23, 0.0 }
 0x1dc   : > { %v1133_v12 = vpop.xlane.xlu1 %1132  ;;  %1266 = vadd.xlane.f32.xlu0 %v2282_v11 }
 0x1dd   : > { %1782 = vpow2.f32 %v1202_v9  ;;  %v1157_v57 = vsub.f32 %v2164_v3, %v1133_v12 }
 0x1de   : > { %v1777_v16 = vpop.eup %1776 }
 0x1df   : > { %v1204_v31 = vmul.f32 1.442695, %v1157_v57  ;;  %v2288_v4 = vsel %vm1061_vm0, %v1777_v16, 0.0 }
 0x1e0   : > { %1268 = vadd.xlane.f32.xlu1 %v2288_v4 }
 0x1e1   : > { %1784 = vpow2.f32 %v1204_v31 }
 0x1e2   : > { %v1779_v63 = vpop.eup %1778 }
 0x1e3   : > { %v2293_v17 = vsel %vm1061_vm0, %v1779_v63, 0.0 }
 0x1e4   : > { %1270 = vadd.xlane.f32.xlu0 %v2293_v17 }
 0x1e6   : > { %v1781_v39 = vpop.eup %1780 }
 0x1e7   : > { %v2298_v3 = vsel %vm1061_vm0, %v1781_v39, 0.0 }
 0x1e8   : > { %1272 = vadd.xlane.f32.xlu1 %v2298_v3 }
 0x1ea   : > { %v1783_v21 = vpop.eup %1782 }
 0x1eb   : > { %v2303_v22 = vsel %vm1061_vm0, %v1783_v21, 0.0 }
 0x1ec   : > { %1274 = vadd.xlane.f32.xlu0 %v2303_v22 }
 0x1ee   : > { %v1785_v13 = vpop.eup %1784 }
 0x1ef   : > { %v2308_v25 = vsel %vm1061_vm0, %v1785_v13, 0.0 }
 0x1f0   : > { %1276 = vadd.xlane.f32.xlu1 %v2308_v25 }
 0x21d   : > { %v1231_v47 = vpop.xlane.xlu0 %1230 }
 0x21e   : > { %1786 = vrcp.f32 %v1231_v47 }
 0x221   : > { %v1233_v26 = vpop.xlane.xlu1 %1232 }
 0x222   : > { %1788 = vrcp.f32 %v1233_v26 }
 0x225   : > { %v1235_v27 = vpop.xlane.xlu0 %1234 }
 0x226   : > { %1790 = vrcp.f32 %v1235_v27 }
 0x229   : > { %v1237_v56 = vpop.xlane.xlu1 %1236 }
 0x22a   : > { %1792 = vrcp.f32 %v1237_v56 }
 0x22b   : > { %v1787_v30 = vpop.eup %1786 }
 0x22c   : > { %v1279_v0 = vmul.f32 %v1787_v30, %v2174_v20 }
 0x22d   : > { %v1239_v41 = vpop.xlane.xlu0 %1238 }
 0x22e   : > { %1326 = vst [vmem:[%s2315_s27] sm:$0xff] %v1279_v0  ;;  %1794 = vrcp.f32 %v1239_v41 }
 0x22f   : > { %v1789_v32 = vpop.eup %1788 }
 0x230   : > { %v1281_v35 = vmul.f32 %v1789_v32, %v2180_v34 }
 0x231   : > { %v1241_v1 = vpop.xlane.xlu1 %1240 }
 0x232   : > { %1327 = vst [vmem:[%s2315_s27 + $0x8] sm:$0xff] %v1281_v35  ;;  %1796 = vrcp.f32 %v1241_v1 }
 0x233   : > { %v1791_v37 = vpop.eup %1790 }
 0x234   : > { %v1283_v48 = vmul.f32 %v1791_v37, %v2186_v36 }
 0x235   : > { %v1243_v10 = vpop.xlane.xlu0 %1242 }
 0x236   : > { %1328 = vst [vmem:[%s2315_s27 + $0x10] sm:$0xff] %v1283_v48  ;;  %1798 = vrcp.f32 %v1243_v10 }
 0x237   : > { %v1793_v42 = vpop.eup %1792 }
 0x238   : > { %v1285_v20 = vmul.f32 %v1793_v42, %v2192_v43 }
 0x239   : > { %v1245_v55 = vpop.xlane.xlu1 %1244 }
 0x23a   : > { %1329 = vst [vmem:[%s2315_s27 + $0x18] sm:$0xff] %v1285_v20  ;;  %1800 = vrcp.f32 %v1245_v55 }
 0x23b   : > { %v1795_v44 = vpop.eup %1794 }
 0x23c   : > { %v1287_v34 = vmul.f32 %v1795_v44, %v2198_v50 }
 0x23d   : > { %v1247_v46 = vpop.xlane.xlu0 %1246 }
 0x23e   : > { %1330 = vst [vmem:[%s2315_s27 + $0x20] sm:$0xff] %v1287_v34  ;;  %1802 = vrcp.f32 %v1247_v46 }
 0x23f   : > { %v1797_v19 = vpop.eup %1796 }
 0x240   : > { %v1289_v36 = vmul.f32 %v1797_v19, %v2204_v54 }
 0x241   : > { %v1249_v51 = vpop.xlane.xlu1 %1248 }
 0x242   : > { %1331 = vst [vmem:[%s2315_s27 + $0x28] sm:$0xff] %v1289_v36  ;;  %1804 = vrcp.f32 %v1249_v51 }
 0x243   : > { %v1799_v62 = vpop.eup %1798 }
 0x244   : > { %v1291_v43 = vmul.f32 %v1799_v62, %v2210_v61 }
 0x245   : > { %v1251_v29 = vpop.xlane.xlu0 %1250 }
 0x246   : > { %1332 = vst [vmem:[%s2315_s27 + $0x30] sm:$0xff] %v1291_v43  ;;  %1806 = vrcp.f32 %v1251_v29 }
 0x247   : > { %v1801_v53 = vpop.eup %1800 }
 0x248   : > { %v1293_v50 = vmul.f32 %v1801_v53, %v2216_v8 }
 0x249   : > { %v1253_v7 = vpop.xlane.xlu1 %1252 }
 0x24a   : > { %1333 = vst [vmem:[%s2315_s27 + $0x38] sm:$0xff] %v1293_v50  ;;  %1808 = vrcp.f32 %v1253_v7 }
 0x24b   : > { %v1803_v58 = vpop.eup %1802 }
 0x24c   : > { %v1295_v54 = vmul.f32 %v1803_v58, %v2222_v14 }
 0x24d   : > { %v1255_v60 = vpop.xlane.xlu0 %1254 }
 0x24e   : > { %1334 = vst [vmem:[%s2315_s27 + $0x40] sm:$0xff] %v1295_v54  ;;  %1810 = vrcp.f32 %v1255_v60 }
 0x24f   : > { %v1805_v38 = vpop.eup %1804 }
 0x250   : > { %v1297_v61 = vmul.f32 %v1805_v38, %v2228_v18 }
 0x251   : > { %v1257_v2 = vpop.xlane.xlu1 %1256 }
 0x252   : > { %1335 = vst [vmem:[%s2315_s27 + $0x48] sm:$0xff] %v1297_v61  ;;  %1812 = vrcp.f32 %v1257_v2 }
 0x253   : > { %v1807_v15 = vpop.eup %1806 }
 0x254   : > { %v1299_v8 = vmul.f32 %v1807_v15, %v2234_v24 }
 0x255   : > { %v1259_v49 = vpop.xlane.xlu0 %1258 }
 0x256   : > { %1336 = vst [vmem:[%s2315_s27 + $0x50] sm:$0xff] %v1299_v8  ;;  %1814 = vrcp.f32 %v1259_v49 }
 0x257   : > { %v1809_v6 = vpop.eup %1808 }
 0x258   : > { %v1301_v14 = vmul.f32 %v1809_v6, %v2240_v28 }
 0x259   : > { %v1261_v23 = vpop.xlane.xlu1 %1260 }
 0x25a   : > { %1337 = vst [vmem:[%s2315_s27 + $0x58] sm:$0xff] %v1301_v14  ;;  %1816 = vrcp.f32 %v1261_v23 }
 0x25b   : > { %v1811_v9 = vpop.eup %1810 }
 0x25c   : > { %v1303_v18 = vmul.f32 %v1811_v9, %v2246_v33 }
 0x25d   : > { %v1263_v12 = vpop.xlane.xlu0 %1262 }
 0x25e   : > { %1338 = vst [vmem:[%s2315_s27 + $0x60] sm:$0xff] %v1303_v18  ;;  %1818 = vrcp.f32 %v1263_v12 }
 0x25f   : > { %v1813_v57 = vpop.eup %1812 }
 0x260   : > { %v1305_v24 = vmul.f32 %v1813_v57, %v2252_v40 }
 0x261   : > { %v1265_v16 = vpop.xlane.xlu1 %1264 }
 0x262   : > { %1339 = vst [vmem:[%s2315_s27 + $0x68] sm:$0xff] %v1305_v24  ;;  %1820 = vrcp.f32 %v1265_v16 }
 0x263   : > { %v1815_v31 = vpop.eup %1814 }
 0x264   : > { %v1307_v28 = vmul.f32 %v1815_v31, %v2258_v45 }
 0x265   : > { %v1267_v63 = vpop.xlane.xlu0 %1266 }
 0x266   : > { %1340 = vst [vmem:[%s2315_s27 + $0x70] sm:$0xff] %v1307_v28  ;;  %1822 = vrcp.f32 %v1267_v63 }
 0x267   : > { %v1817_v39 = vpop.eup %1816 }
 0x268   : > { %v1309_v33 = vmul.f32 %v1817_v39, %v2264_v52 }
 0x269   : > { %v1269_v21 = vpop.xlane.xlu1 %1268 }
 0x26a   : > { %1341 = vst [vmem:[%s2315_s27 + $0x78] sm:$0xff] %v1309_v33  ;;  %1824 = vrcp.f32 %v1269_v21 }
 0x26b   : > { %v1819_v13 = vpop.eup %1818 }
 0x26c   : > { %v1311_v40 = vmul.f32 %v1819_v13, %v2270_v59 }
 0x26d   : > { %v1271_v47 = vpop.xlane.xlu0 %1270 }
 0x26e   : > { %1342 = vst [vmem:[%s2315_s27 + $0x80] sm:$0xff] %v1311_v40  ;;  %1826 = vrcp.f32 %v1271_v47 }
 0x26f   : > { %v1821_v26 = vpop.eup %1820 }
 0x270   : > { %v1313_v45 = vmul.f32 %v1821_v26, %v2276_v5 }
 0x271   : > { %v1273_v27 = vpop.xlane.xlu1 %1272 }
 0x272   : > { %1343 = vst [vmem:[%s2315_s27 + $0x88] sm:$0xff] %v1313_v45  ;;  %1828 = vrcp.f32 %v1273_v27 }
 0x273   : > { %v1823_v52 = vpop.eup %1822 }
 0x274   : > { %v1315_v56 = vmul.f32 %v1823_v52, %v2282_v11 }
 0x275   : > { %v1275_v30 = vpop.xlane.xlu0 %1274 }
 0x276   : > { %1344 = vst [vmem:[%s2315_s27 + $0x90] sm:$0xff] %v1315_v56  ;;  %1830 = vrcp.f32 %v1275_v30 }
 0x277   : > { %v1825_v59 = vpop.eup %1824 }
 0x278   : > { %v1317_v0 = vmul.f32 %v1825_v59, %v2288_v4 }
 0x279   : > { %v1277_v41 = vpop.xlane.xlu1 %1276 }
 0x27a   : > { %1345 = vst [vmem:[%s2315_s27 + $0x98] sm:$0xff] %v1317_v0  ;;  %1832 = vrcp.f32 %v1277_v41 }
 0x27b   : > { %v1827_v5 = vpop.eup %1826 }
 0x27c   : > { %v1319_v32 = vmul.f32 %v1827_v5, %v2293_v17 }
 0x27e   : > { %1346 = vst [vmem:[%s2315_s27 + $0xa0] sm:$0xff] %v1319_v32 }
 0x27f   : > { %v1829_v35 = vpop.eup %1828 }
 0x280   : > { %v1321_v1 = vmul.f32 %v1829_v35, %v2298_v3 }
 0x282   : > { %1347 = vst [vmem:[%s2315_s27 + $0xa8] sm:$0xff] %v1321_v1 }
 0x283   : > { %v1831_v11 = vpop.eup %1830 }
 0x284   : > { %v1323_v37 = vmul.f32 %v1831_v11, %v2303_v22 }
 0x286   : > { %1348 = vst [vmem:[%s2315_s27 + $0xb0] sm:$0xff] %v1323_v37 }
 0x287   : > { %v1833_v48 = vpop.eup %1832 }
 0x288   : > { %v1325_v10 = vmul.f32 %v1833_v48, %v2308_v25 }
 0x28a   : > { %1349 = vst [vmem:[%s2315_s27 + $0xb8] sm:$0xff] %v1325_v10 }
 0x28b PF: > { %s13_s14 = sadd.s32 1, %s1856_s14   ;;  %s2378_s12 = smov %s1852_s13 }
 0x28c   : > { %p10_p5 = scmp.ge.s32.totalorder %s13_s14, 4   ;;  %s2379_s13 = smov %s2381_s15 }
 0x28e   :  { %12 = sbr.rel (!%p10_p5) target bundleno = 2 (0x2), region = 71 }

// kernel: gcn_forward.4
= control target key start
LH: loop header
LB: loop body
LE: loop exit
PB: predicated region body
PF: predicated region fallthrough
CT: control target
= control target key end

     0   :  { %s2067_s15 = smov 0   ;;  %s2069_s16 = smov 0   ;;  %s2284_s0 = inlined_call_operand.vmem [shape: bf16[384,384], index: 0, kind: input, shape index: {}]   ;;  %s2285_s1 = inlined_call_operand.vmem [shape: bf16[384,128], index: 1, kind: input, shape index: {}]   ;;  %s2286_s2 = inlined_call_operand.vmem [shape: f32[1,128], index: 2, kind: input, shape index: {}]   ;;  %s2287_s3 = inlined_call_operand.vmem [shape: bf16[128,128], index: 3, kind: input, shape index: {}]   ;;  %s2288_s4 = inlined_call_operand.vmem [shape: bf16[384,128], index: 4, kind: output, shape index: {}]  }
   0x1   :  { %s2071_s17 = smov 0  }
   0x2 LB: > { %s26_s18 = sadd.s32 1, %s2036_s16  ;;  %p1512_p0 = scmp.ge.s32.totalorder %s2040_s17, 1  ;;  %s2040_s17 = sphi %s2071_s17, %s14_s17   ;;  %s2036_s16 = sphi %s2069_s16, %s2290_s16   ;;  %s2032_s15 = sphi %s2067_s15, %s2289_s15  }
   0x3   : > { %p28_p1 = scmp.ge.s32.totalorder %s26_s18, 2  ;;  %p183_p2 = scmp.lt.s32.totalorder %s2040_s17, 3 }
   0x5   : > { %s2292_s18 = smov (%p28_p1, %s26_s18), 0  ;;  %p184_p3 = pnand %p1512_p0, %p183_p2 }
   0x6   : > { %s214_s7 = smul.u32 (!%p184_p3), 24, %s2032_s15 }
   0x7   : > { %187 = sbr.rel (%p184_p3) target bundleno = 544 (0x220), region = 36 }
   0x8   : > { %p216_p4 = scmp.lt.s32.totalorder (!%p184_p3), %s214_s7, 47 }
   0xc   : > { %v1938_v0 = vld [vmem:[%s2285_s1 + $0x78] sm:$0xff]   ;;  %v1941_v3 = vld [vmem:[%s2285_s1 + $0x70] sm:$0xff]   ;;  %v1944_v6 = vld [vmem:[%s2285_s1 + $0x68] sm:$0xff]   ;;  %s2294_s7 = smov (!%p216_p4, %s214_s7), 47 }
   0xd   : > { %v1939_v1 = vld [vmem:[%s2285_s1 + $0x38] sm:$0xff]   ;;  %1705 = vmatprep.subr.bf16.mxu0 %v1938_v0  ;;  %v1942_v4 = vld [vmem:[%s2285_s1 + $0x30] sm:$0xff]   ;;  %v1945_v7 = vld [vmem:[%s2285_s1 + $0x28] sm:$0xff]   ;;  %s1913_s5 = smul.u32 12, %s2294_s7 }
   0xe   : > { %v1940_v2 = vld [vmem:[%s2285_s1 + $0xb8] sm:$0xff]   ;;  %1706 = vmatpush3.bf16.msra.mxu0 %v1939_v1  ;;  %v1943_v5 = vld [vmem:[%s2285_s1 + $0xb0] sm:$0xff]   ;;  %v1946_v8 = vld [vmem:[%s2285_s1 + $0xa8] sm:$0xff]  }
   0xf   : > { %1833 = vmatprep.subr.bf16.mxu1 %v1940_v2  ;;  %1707 = vmatprep.subr.bf16.mxu0 %v1941_v3  ;;  %v1947_v9 = vld [vmem:[%s2285_s1 + $0x60] sm:$0xff]   ;;  %v1950_v12 = vld [vmem:[%s2285_s1 + $0x58] sm:$0xff]   ;;  %v1953_v15 = vld [vmem:[%s2285_s1 + $0x50] sm:$0xff]   ;;  %s2157_s20 = scalar_lea.vmem %s2284_s0, %s1913_s5 }
  0x10   : > { %1834 = vmatpush3.bf16.msra.mxu1 %v1940_v2  ;;  %v1948_v10 = vld [vmem:[%s2285_s1 + $0x20] sm:$0xff]   ;;  %v1952_v13 = vld [vmem:[%s2285_s1 + $0x98] sm:$0xff]   ;;  %v1955_v16 = vld [vmem:[%s2285_s1 + $0x90] sm:$0xff]  }
  0x11   : > { %1835 = vmatprep.subr.bf16.mxu1 %v1943_v5  ;;  %v1949_v11 = vld [vmem:[%s2285_s1 + $0xa0] sm:$0xff]   ;;  %v1951_v14 = vld [vmem:[%s2285_s1 + $0x18] sm:$0xff]   ;;  %v1954_v17 = vld [vmem:[%s2285_s1 + $0x10] sm:$0xff]  }
  0x12   : > { %1708 = vmatpush3.bf16.msra.mxu0 %v1942_v4  ;;  %v1956_v18 = vld [vmem:[%s2285_s1 + $0x48] sm:$0xff]   ;;  %v1959_v21 = vld [vmem:[%s2285_s1 + $0x40] sm:$0xff]   ;;  %v1974_v32 = vld [vmem:[%s2157_s20 + $0x50] ss:$12 sps:$4 sm:$0xff]  }
  0x13   : > { %1709 = vmatprep.subr.bf16.mxu0 %v1944_v6  ;;  %v1957_v19 = vld [vmem:[%s2285_s1 + $0x8] sm:$0xff]   ;;  %v1961_v22 = vld [vmem:[%s2285_s1 + $0x80] sm:$0xff]   ;;  %v1972_v34 = vld [vmem:[%s2157_s20 + $0x30] ss:$12 sps:$4 sm:$0xff]  }
  0x14   : > { %1836 = vmatpush3.bf16.msra.mxu1 %v1943_v5  ;;  %v1958_v20 = vld [vmem:[%s2285_s1 + $0x88] sm:$0xff]   ;;  %v1964_v23 = vld [vmem:[%s2157_s20 + $0x4] ss:$12 sps:$4 sm:$0xff]   ;;  %v1970_v31 = vld [vmem:[%s2157_s20 + $0x34] ss:$12 sps:$4 sm:$0xff]  }
  0x15   : > { %1837 = vmatprep.subr.bf16.mxu1 %v1946_v8  ;;  %v1965_v24 = vld [vmem:[%s2157_s20 + $0x8] ss:$12 sps:$4 sm:$0xff]   ;;  %v1960_v25 = vld [vmem:[%s2285_s1] sm:$0xff]   ;;  %754 = vmatprep.mubr.bf16.mxu0 %v1964_v23  ;;  %v1975_v35 = vld [vmem:[%s2157_s20 + $0x4c] ss:$12 sps:$4 sm:$0xff]  }
  0x16   : > { %1710 = vmatpush3.bf16.msra.mxu0 %v1945_v7  ;;  %1849 = vmatprep.mubr.bf16.mxu1 %v1965_v24  ;;  %v1962_v26 = vld [vmem:[%s2157_s20] ss:$12 sps:$4 sm:$0xff]   ;;  %v1967_v27 = vld [vmem:[%s2157_s20 + $0x1c] ss:$12 sps:$4 sm:$0xff]   ;;  %v1973_v29 = vld [vmem:[%s2157_s20 + $0x38] ss:$12 sps:$4 sm:$0xff]  }
  0x17   : > { %1711 = vmatprep.subr.bf16.mxu0 %v1947_v9  ;;  %v1966_v28 = vld [vmem:[%s2157_s20 + $0x20] ss:$12 sps:$4 sm:$0xff]   ;;  %v1969_v30 = vld [vmem:[%s2157_s20 + $0x18] ss:$12 sps:$4 sm:$0xff]   ;;  %v1981_v33 = vld [vmem:[%s2157_s20 + $0x68] ss:$12 sps:$4 sm:$0xff]  }
  0x18   : > { %1838 = vmatpush3.bf16.msra.mxu1 %v1946_v8  ;;  %v1982_v36 = vld [vmem:[%s2157_s20 + $0x80] ss:$12 sps:$4 sm:$0xff]   ;;  %v1989_v37 = vld [vmem:[%s2157_s20 + $0x98] ss:$12 sps:$4 sm:$0xff]   ;;  %v1977_v38 = vld [vmem:[%s2157_s20 + $0x48] ss:$12 sps:$4 sm:$0xff]  }
  0x19   : > { %1839 = vmatprep.subr.bf16.mxu1 %v1949_v11  ;;  %v2010_v39 = vld [vmem:[%s2287_s3 + $0x38] sm:$0xff]   ;;  %v1978_v40 = vld [vmem:[%s2157_s20 + $0x64] ss:$12 sps:$4 sm:$0xff]   ;;  %v1997_v43 = vld [vmem:[%s2157_s20 + $0xc8] ss:$12 sps:$4 sm:$0xff]  }
  0x1a   : > { %1712 = vmatpush3.bf16.msra.mxu0 %v1948_v10  ;;  %v2011_v41 = vld [vmem:[%s2287_s3 + $0x30] sm:$0xff]   ;;  %v1980_v44 = vld [vmem:[%s2157_s20 + $0x60] ss:$12 sps:$4 sm:$0xff]   ;;  %v1983_v45 = vld [vmem:[%s2157_s20 + $0x7c] ss:$12 sps:$4 sm:$0xff]  }
  0x1b   : > { %1713 = vmatprep.subr.bf16.mxu0 %v1950_v12  ;;  %v1990_v42 = vld [vmem:[%s2157_s20 + $0xb0] ss:$12 sps:$4 sm:$0xff]   ;;  %v1998_v46 = vld [vmem:[%s2157_s20 + $0xe0] ss:$12 sps:$4 sm:$0xff]   ;;  %v2005_v47 = vld [vmem:[%s2157_s20 + $0xf8] ss:$12 sps:$4 sm:$0xff]  }
  0x1c   : > { %1840 = vmatpush3.bf16.msra.mxu1 %v1949_v11  ;;  %v1985_v48 = vld [vmem:[%s2157_s20 + $0x78] ss:$12 sps:$4 sm:$0xff]   ;;  %v1986_v49 = vld [vmem:[%s2157_s20 + $0x94] ss:$12 sps:$4 sm:$0xff]   ;;  %v2006_v50 = vld [vmem:[%s2157_s20 + $0x110] ss:$12 sps:$4 sm:$0xff]  }
  0x1d   : > { %1841 = vmatprep.subr.bf16.mxu1 %v1952_v13  ;;  %v1988_v51 = vld [vmem:[%s2157_s20 + $0x90] ss:$12 sps:$4 sm:$0xff]   ;;  %v1991_v52 = vld [vmem:[%s2157_s20 + $0xac] ss:$12 sps:$4 sm:$0xff]   ;;  %v1993_v53 = vld [vmem:[%s2157_s20 + $0xa8] ss:$12 sps:$4 sm:$0xff]  }
  0x1e   : > { %1714 = vmatpush3.bf16.msra.mxu0 %v1951_v14  ;;  %v1994_v54 = vld [vmem:[%s2157_s20 + $0xc4] ss:$12 sps:$4 sm:$0xff]   ;;  %v1996_v55 = vld [vmem:[%s2157_s20 + $0xc0] ss:$12 sps:$4 sm:$0xff]   ;;  %v1999_v56 = vld [vmem:[%s2157_s20 + $0xdc] ss:$12 sps:$4 sm:$0xff]  }
  0x1f   : > { %1715 = vmatprep.subr.bf16.mxu0 %v1953_v15  ;;  %v2012_v57 = vld [vmem:[%s2287_s3 + $0x28] sm:$0xff]   ;;  %v2013_v58 = vld [vmem:[%s2287_s3 + $0x20] sm:$0xff]   ;;  %v2014_v61 = vld [vmem:[%s2287_s3 + $0x18] sm:$0xff]  }
  0x20   : > { %1842 = vmatpush3.bf16.msra.mxu1 %v1952_v13  ;;  %v2001_v59 = vld [vmem:[%s2157_s20 + $0xd8] ss:$12 sps:$4 sm:$0xff]   ;;  %v2002_v60 = vld [vmem:[%s2157_s20 + $0xf4] ss:$12 sps:$4 sm:$0xff]   ;;  %v2004_v63 = vld [vmem:[%s2157_s20 + $0xf0] ss:$12 sps:$4 sm:$0xff]  }
  0x21   : > { %1843 = vmatprep.subr.bf16.mxu1 %v1955_v16  ;;  %v2015_v62 = vld [vmem:[%s2287_s3 + $0x10] sm:$0xff]   ;;  %v2007_v0 = vld [vmem:[%s2157_s20 + $0x10c] ss:$12 sps:$4 sm:$0xff]   ;;  %v2017_v2 = vld [vmem:[%s2287_s3] sm:$0xff]  }
  0x22   : > { %1716 = vmatpush3.bf16.msra.mxu0 %v1954_v17  ;;  %v2016_v1 = vld [vmem:[%s2287_s3 + $0x8] sm:$0xff]   ;;  %v2231_v11 = vld [vmem:[%s2286_s2] ss:$0 sm:$0xff] }
  0x23   : > { %1717 = vmatprep.subr.bf16.mxu0 %v1956_v18  ;;  %v2009_v3 = vld [vmem:[%s2157_s20 + $0x108] ss:$12 sps:$4 sm:$0xff]   ;;  %s1514_s20 = sshll.u32 %s2294_s7, 2 }
  0x24   : > { %1844 = vmatpush3.bf16.msra.mxu1 %v1955_v16  ;;  %s2261_s26 = scalar_lea.vmem %s2288_s4, %s1514_s20 }
  0x25   : > { %1845 = vmatprep.subr.bf16.mxu1 %v1958_v20 }
  0x26   : > { %1718 = vmatpush3.bf16.msra.mxu0 %v1957_v19 }
  0x27   : > { %1719 = vmatprep.subr.bf16.mxu0 %v1959_v21 }
  0x28   : > { %1846 = vmatpush3.bf16.msra.mxu1 %v1958_v20 }
  0x29   : > { %1847 = vmatprep.subr.bf16.mxu1 %v1961_v22 }
  0x2a   : > { %1720 = vmatpush3.bf16.msra.mxu0 %v1960_v25 }
  0x2c   : > { %1848 = vmatpush3.bf16.msra.mxu1 %v1961_v22 }
  0x2d   : > { %755 = vmatmul.mubr.bf16.vlgmr.msra.gmra.mxu0 %v1962_v26  ;;  %1873 = vmatprep.subr.bf16.mxu1 %v2010_v39 }
  0x2e   : > { %762 = vmatprep.mubr.bf16.mxu0 %v1967_v27 }
  0x2f   : > { %1850 = vmatmul.mubr.bf16.vlgmr.msra.gmra.mxu1 %v1966_v28 }
  0x30   : > { %1853 = vmatprep.mubr.bf16.mxu1 %v1973_v29  ;;  %1874 = vmatpush3.bf16.msra.mxu1 %v2010_v39 }
  0x31   : > { %1875 = vmatprep.subr.bf16.mxu1 %v2011_v41 }
  0x34   : > { %1876 = vmatpush3.bf16.msra.mxu1 %v2011_v41 }
  0x35   : > { %763 = vmatmul.mubr.bf16.gmra.mxu0 %v1969_v30  ;;  %1877 = vmatprep.subr.bf16.mxu1 %v2012_v57 }
  0x36   : > { %770 = vmatprep.mubr.bf16.mxu0 %v1970_v31 }
  0x37   : > { %1854 = vmatmul.mubr.bf16.gmra.mxu1 %v1974_v32 }
  0x38   : > { %1857 = vmatprep.mubr.bf16.mxu1 %v1981_v33  ;;  %1878 = vmatpush3.bf16.msra.mxu1 %v2012_v57 }
  0x39   : > { %1879 = vmatprep.subr.bf16.mxu1 %v2013_v58 }
  0x3c   : > { %1880 = vmatpush3.bf16.msra.mxu1 %v2013_v58 }
  0x3d   : > { %771 = vmatmul.mubr.bf16.gmra.mxu0 %v1972_v34  ;;  %1881 = vmatprep.subr.bf16.mxu1 %v2014_v61 }
  0x3e   : > { %778 = vmatprep.mubr.bf16.mxu0 %v1975_v35 }
  0x3f   : > { %1858 = vmatmul.mubr.bf16.gmra.mxu1 %v1982_v36 }
  0x40   : > { %1861 = vmatprep.mubr.bf16.mxu1 %v1989_v37  ;;  %1882 = vmatpush3.bf16.msra.mxu1 %v2014_v61 }
  0x41   : > { %1883 = vmatprep.subr.bf16.mxu1 %v2015_v62 }
  0x44   : > { %1884 = vmatpush3.bf16.msra.mxu1 %v2015_v62 }
  0x45   : > { %779 = vmatmul.mubr.bf16.gmra.mxu0 %v1977_v38  ;;  %1885 = vmatprep.subr.bf16.mxu1 %v2016_v1 }
  0x46   : > { %786 = vmatprep.mubr.bf16.mxu0 %v1978_v40 }
  0x47   : > { %1862 = vmatmul.mubr.bf16.gmra.mxu1 %v1990_v42 }
  0x48   : > { %1865 = vmatprep.mubr.bf16.mxu1 %v1997_v43  ;;  %1886 = vmatpush3.bf16.msra.mxu1 %v2016_v1 }
  0x49   : > { %1887 = vmatprep.subr.bf16.mxu1 %v2017_v2 }
  0x4c   : > { %1888 = vmatpush3.bf16.msra.mxu1 %v2017_v2 }
  0x4d   : > { %787 = vmatmul.mubr.bf16.gmra.mxu0 %v1980_v44 }
  0x4e   : > { %794 = vmatprep.mubr.bf16.mxu0 %v1983_v45 }
  0x4f   : > { %1866 = vmatmul.mubr.bf16.gmra.mxu1 %v1998_v46 }
  0x50   : > { %1869 = vmatprep.mubr.bf16.mxu1 %v2005_v47 }
  0x55   : > { %795 = vmatmul.mubr.bf16.gmra.mxu0 %v1985_v48 }
  0x56   : > { %802 = vmatprep.mubr.bf16.mxu0 %v1986_v49 }
  0x57   : > { %1870 = vmatmul.mubr.bf16.gmra.mxu1 %v2006_v50 }
  0x5d   : > { %803 = vmatmul.mubr.bf16.gmra.mxu0 %v1988_v51 }
  0x5e   : > { %810 = vmatprep.mubr.bf16.mxu0 %v1991_v52 }
  0x65   : > { %811 = vmatmul.mubr.bf16.gmra.mxu0 %v1993_v53 }
  0x66   : > { %818 = vmatprep.mubr.bf16.mxu0 %v1994_v54 }
  0x6d   : > { %819 = vmatmul.mubr.bf16.gmra.mxu0 %v1996_v55 }
  0x6e   : > { %826 = vmatprep.mubr.bf16.mxu0 %v1999_v56 }
  0x75   : > { %827 = vmatmul.mubr.bf16.gmra.mxu0 %v2001_v59 }
  0x76   : > { %834 = vmatprep.mubr.bf16.mxu0 %v2002_v60 }
  0x7d   : > { %835 = vmatmul.mubr.bf16.gmra.mxu0 %v2004_v63 }
  0x7e   : > { %842 = vmatprep.mubr.bf16.mxu0 %v2007_v0 }
  0x85   : > { %843 = vmatmul.mubr.bf16.gmra.mxu0 %v2009_v3 }
  0xed   : > { %v1721_v4 = vpop.f32.mrf.mxu0 }
  0xef   : > { %v1722_v5 = vpop.f32.mrf.mxu0  ;;  %v1851_v6 = vpop.f32.mrf.mxu1 }
  0xf0   : > { %v1723_v7 = vadd.f32 %v1722_v5, %v1721_v4 }
  0xf1   : > { %v1724_v8 = vpop.f32.mrf.mxu0  ;;  %v885_v9 = vpop.f32.mrf.mxu1 }
  0xf2   : > { %v886_v10 = vadd.f32 %v1723_v7, %v885_v9 }
  0xf3   : > { %v1725_v12 = vpop.f32.mrf.mxu0  ;;  %v1852_v13 = vpop.f32.mrf.mxu1 }
  0xf4   : > { %v1726_v14 = vadd.f32 %v1725_v12, %v1724_v8  ;;  %v1062_v17 = vadd.f32 %v2231_v11, %v886_v10 }
  0xf5   : > { %v1727_v15 = vpop.f32.mrf.mxu0  ;;  %v888_v16 = vpop.f32.mrf.mxu1 }
  0xf6   : > { %v889_v18 = vadd.f32 %v1726_v14, %v888_v16  ;;  %v1086_v24 = vmax.f32 %v1062_v17, 0.0 }
  0xf7   : > { %v1728_v19 = vpop.f32.mrf.mxu0  ;;  %v1855_v20 = vpop.f32.mrf.mxu1 }
  0xf8   : > { %v1063_v21 = vadd.f32 %v2231_v11, %v889_v18  ;;  %v1729_v22 = vadd.f32 %v1728_v19, %v1727_v15 }
  0xf9   : > { %v1730_v23 = vpop.f32.mrf.mxu0  ;;  %v901_v28 = vpop.f32.mrf.mxu1 }
  0xfa   : > { %v1087_v25 = vmax.f32 %v1063_v21, 0.0  ;;  %v894_v26 = vadd.f32 %v1851_v6, %v1729_v22 }
  0xfb   : > { %v1731_v27 = vpop.f32.mrf.mxu0  ;;  %v1856_v35 = vpop.f32.mrf.mxu1 }
  0xfc   : > { %v1732_v29 = vadd.f32 %v1731_v27, %v1730_v23  ;;  %v1110_v30 = vpack.c.bf16 %v1087_v25, %v1086_v24  ;;  %v1064_v32 = vadd.f32 %v2231_v11, %v894_v26 }
  0xfd   : > { %v1733_v31 = vpop.f32.mrf.mxu0  ;;  %v904_v43 = vpop.f32.mrf.mxu1 }
  0xfe   : > { %v897_v33 = vadd.f32 %v1852_v13, %v1732_v29  ;;  %1889 = vmatprep.mubr.bf16.mxu1 %v1110_v30  ;;  %v1088_v39 = vmax.f32 %v1064_v32, 0.0 }
  0xff   : > { %v1734_v34 = vpop.f32.mrf.mxu0  ;;  %v1859_v50 = vpop.f32.mrf.mxu1 }
 0x100   : > { %v1065_v36 = vadd.f32 %v2231_v11, %v897_v33  ;;  %v1735_v37 = vadd.f32 %v1734_v34, %v1733_v31 }
 0x101   : > { %v1736_v38 = vpop.f32.mrf.mxu0  ;;  %v917_v58 = vpop.f32.mrf.mxu1 }
 0x102   : > { %v1089_v40 = vmax.f32 %v1065_v36, 0.0  ;;  %v902_v41 = vadd.f32 %v1735_v37, %v901_v28 }
 0x103   : > { %v1737_v42 = vpop.f32.mrf.mxu0  ;;  %v1860_v1 = vpop.f32.mrf.mxu1 }
 0x104   : > { %v1111_v44 = vpack.c.bf16 %v1089_v40, %v1088_v39  ;;  %v1738_v45 = vadd.f32 %v1737_v42, %v1736_v38  ;;  %v1066_v47 = vadd.f32 %v2231_v11, %v902_v41 }
 0x105   : > { %v1739_v46 = vpop.f32.mrf.mxu0  ;;  %v920_v9 = vpop.f32.mrf.mxu1 }
 0x106   : > { %v905_v48 = vadd.f32 %v1738_v45, %v904_v43  ;;  %1890 = vmatmul.mubr.bf16.vlgmr.msra.gmra.mxu1 %v1111_v44  ;;  %v1090_v54 = vmax.f32 %v1066_v47, 0.0 }
 0x107   : > { %v1740_v49 = vpop.f32.mrf.mxu0  ;;  %v1863_v17 = vpop.f32.mrf.mxu1 }
 0x108   : > { %v1067_v51 = vadd.f32 %v2231_v11, %v905_v48  ;;  %v1741_v52 = vadd.f32 %v1740_v49, %v1739_v46 }
 0x109   : > { %v1742_v53 = vpop.f32.mrf.mxu0  ;;  %v933_v25 = vpop.f32.mrf.mxu1 }
 0x10a   : > { %v1091_v55 = vmax.f32 %v1067_v51, 0.0  ;;  %v910_v56 = vadd.f32 %v1855_v20, %v1741_v52 }
 0x10b   : > { %v1743_v57 = vpop.f32.mrf.mxu0  ;;  %v1864_v32 = vpop.f32.mrf.mxu1 }
 0x10c   : > { %v1744_v59 = vadd.f32 %v1743_v57, %v1742_v53  ;;  %v1112_v60 = vpack.c.bf16 %v1091_v55, %v1090_v54  ;;  %v1068_v62 = vadd.f32 %v2231_v11, %v910_v56 }
 0x10d   : > { %v1745_v61 = vpop.f32.mrf.mxu0  ;;  %v936_v40 = vpop.f32.mrf.mxu1 }
 0x10e   : > { %v913_v63 = vadd.f32 %v1856_v35, %v1744_v59  ;;  %1893 = vmatprep.mubr.bf16.mxu1 %v1112_v60  ;;  %v1092_v5 = vmax.f32 %v1068_v62, 0.0 }
 0x10f   : > { %v1746_v0 = vpop.f32.mrf.mxu0  ;;  %v1867_v47 = vpop.f32.mrf.mxu1 }
 0x110   : > { %v1069_v2 = vadd.f32 %v2231_v11, %v913_v63  ;;  %v1747_v3 = vadd.f32 %v1746_v0, %v1745_v61 }
 0x111   : > { %v1748_v4 = vpop.f32.mrf.mxu0  ;;  %v949_v55 = vpop.f32.mrf.mxu1 }
 0x112   : > { %v1093_v6 = vmax.f32 %v1069_v2, 0.0  ;;  %v918_v7 = vadd.f32 %v1747_v3, %v917_v58 }
 0x113   : > { %v1749_v8 = vpop.f32.mrf.mxu0  ;;  %v1868_v62 = vpop.f32.mrf.mxu1 }
 0x114   : > { %v1750_v10 = vadd.f32 %v1749_v8, %v1748_v4  ;;  %v1113_v12 = vpack.c.bf16 %v1093_v6, %v1092_v5  ;;  %v1070_v14 = vadd.f32 %v2231_v11, %v918_v7 }
 0x115   : > { %v1751_v13 = vpop.f32.mrf.mxu0  ;;  %v952_v6 = vpop.f32.mrf.mxu1 }
 0x116   : > { %v921_v15 = vadd.f32 %v1750_v10, %v920_v9  ;;  %1894 = vmatmul.mubr.bf16.gmra.mxu1 %v1113_v12  ;;  %v1094_v21 = vmax.f32 %v1070_v14, 0.0 }
 0x117   : > { %v1752_v16 = vpop.f32.mrf.mxu0  ;;  %v1871_v14 = vpop.f32.mrf.mxu1 }
 0x118   : > { %v1071_v18 = vadd.f32 %v2231_v11, %v921_v15  ;;  %v1753_v19 = vadd.f32 %v1752_v16, %v1751_v13 }
 0x119   : > { %v1754_v20 = vpop.f32.mrf.mxu0 }
 0x11a   : > { %v1095_v22 = vmax.f32 %v1071_v18, 0.0  ;;  %v926_v23 = vadd.f32 %v1859_v50, %v1753_v19 }
 0x11b   : > { %v1755_v24 = vpop.f32.mrf.mxu0 }
 0x11c   : > { %v1756_v26 = vadd.f32 %v1755_v24, %v1754_v20  ;;  %v1114_v27 = vpack.c.bf16 %v1095_v22, %v1094_v21  ;;  %v1072_v29 = vadd.f32 %v2231_v11, %v926_v23  ;;  %v965_v22 = vpop.f32.mrf.mxu1 }
 0x11d   : > { %v1757_v28 = vpop.f32.mrf.mxu0 }
 0x11e   : > { %v929_v30 = vadd.f32 %v1860_v1, %v1756_v26  ;;  %1897 = vmatprep.mubr.bf16.mxu1 %v1114_v27  ;;  %v1096_v36 = vmax.f32 %v1072_v29, 0.0  ;;  %v1872_v29 = vpop.f32.mrf.mxu1 }
 0x11f   : > { %v1758_v31 = vpop.f32.mrf.mxu0 }
 0x120   : > { %v1073_v33 = vadd.f32 %v2231_v11, %v929_v30  ;;  %v1759_v34 = vadd.f32 %v1758_v31, %v1757_v28 }
 0x121   : > { %v1760_v35 = vpop.f32.mrf.mxu0 }
 0x122   : > { %v1097_v37 = vmax.f32 %v1073_v33, 0.0  ;;  %v934_v38 = vadd.f32 %v1759_v34, %v933_v25 }
 0x123   : > { %v1761_v39 = vpop.f32.mrf.mxu0 }
 0x124   : > { %v1762_v41 = vadd.f32 %v1761_v39, %v1760_v35  ;;  %v1115_v42 = vpack.c.bf16 %v1097_v37, %v1096_v36  ;;  %v1074_v44 = vadd.f32 %v2231_v11, %v934_v38  ;;  %v968_v37 = vpop.f32.mrf.mxu1 }
 0x125   : > { %v1763_v43 = vpop.f32.mrf.mxu0 }
 0x126   : > { %v937_v45 = vadd.f32 %v1762_v41, %v936_v40  ;;  %1898 = vmatmul.mubr.bf16.gmra.mxu1 %v1115_v42  ;;  %v1098_v51 = vmax.f32 %v1074_v44, 0.0 }
 0x127   : > { %v1764_v46 = vpop.f32.mrf.mxu0 }
 0x128   : > { %v1075_v48 = vadd.f32 %v2231_v11, %v937_v45  ;;  %v1765_v49 = vadd.f32 %v1764_v46, %v1763_v43 }
 0x129   : > { %v1766_v50 = vpop.f32.mrf.mxu0 }
 0x12a   : > { %v1099_v52 = vmax.f32 %v1075_v48, 0.0  ;;  %v942_v53 = vadd.f32 %v1863_v17, %v1765_v49 }
 0x12b   : > { %v1767_v54 = vpop.f32.mrf.mxu0 }
 0x12c   : > { %v1768_v56 = vadd.f32 %v1767_v54, %v1766_v50  ;;  %v1116_v57 = vpack.c.bf16 %v1099_v52, %v1098_v51  ;;  %v1076_v59 = vadd.f32 %v2231_v11, %v942_v53 }
 0x12d   : > { %v1769_v58 = vpop.f32.mrf.mxu0 }
 0x12e   : > { %v945_v60 = vadd.f32 %v1864_v32, %v1768_v56  ;;  %1901 = vmatprep.mubr.bf16.mxu1 %v1116_v57  ;;  %v1100_v2 = vmax.f32 %v1076_v59, 0.0 }
 0x12f   : > { %v1770_v61 = vpop.f32.mrf.mxu0 }
 0x130   : > { %v1077_v63 = vadd.f32 %v2231_v11, %v945_v60  ;;  %v1771_v0 = vadd.f32 %v1770_v61, %v1769_v58 }
 0x131   : > { %v1772_v1 = vpop.f32.mrf.mxu0 }
 0x132   : > { %v1101_v3 = vmax.f32 %v1077_v63, 0.0  ;;  %v950_v4 = vadd.f32 %v1771_v0, %v949_v55 }
 0x133   : > { %v1773_v5 = vpop.f32.mrf.mxu0 }
 0x134   : > { %v1774_v7 = vadd.f32 %v1773_v5, %v1772_v1  ;;  %v1117_v8 = vpack.c.bf16 %v1101_v3, %v1100_v2  ;;  %v1078_v10 = vadd.f32 %v2231_v11, %v950_v4 }
 0x135   : > { %v1775_v9 = vpop.f32.mrf.mxu0 }
 0x136   : > { %v953_v12 = vadd.f32 %v1774_v7, %v952_v6  ;;  %1902 = vmatmul.mubr.bf16.gmra.mxu1 %v1117_v8  ;;  %v1102_v18 = vmax.f32 %v1078_v10, 0.0 }
 0x137   : > { %v1776_v13 = vpop.f32.mrf.mxu0 }
 0x138   : > { %v1079_v15 = vadd.f32 %v2231_v11, %v953_v12  ;;  %v1777_v16 = vadd.f32 %v1776_v13, %v1775_v9 }
 0x139   : > { %v1778_v17 = vpop.f32.mrf.mxu0 }
 0x13a   : > { %v1103_v19 = vmax.f32 %v1079_v15, 0.0  ;;  %v958_v20 = vadd.f32 %v1867_v47, %v1777_v16 }
 0x13b   : > { %v1779_v21 = vpop.f32.mrf.mxu0 }
 0x13c   : > { %v1780_v23 = vadd.f32 %v1779_v21, %v1778_v17  ;;  %v1118_v24 = vpack.c.bf16 %v1103_v19, %v1102_v18  ;;  %v1080_v26 = vadd.f32 %v2231_v11, %v958_v20 }
 0x13d   : > { %v1781_v25 = vpop.f32.mrf.mxu0 }
 0x13e   : > { %v961_v27 = vadd.f32 %v1868_v62, %v1780_v23  ;;  %1905 = vmatprep.mubr.bf16.mxu1 %v1118_v24  ;;  %v1104_v33 = vmax.f32 %v1080_v26, 0.0 }
 0x13f   : > { %v1782_v28 = vpop.f32.mrf.mxu0 }
 0x140   : > { %v1081_v30 = vadd.f32 %v2231_v11, %v961_v27  ;;  %v1783_v31 = vadd.f32 %v1782_v28, %v1781_v25 }
 0x141   : > { %v1784_v32 = vpop.f32.mrf.mxu0 }
 0x142   : > { %v1105_v34 = vmax.f32 %v1081_v30, 0.0  ;;  %v966_v35 = vadd.f32 %v1783_v31, %v965_v22 }
 0x143   : > { %v1785_v36 = vpop.f32.mrf.mxu0 }
 0x144   : > { %v1786_v38 = vadd.f32 %v1785_v36, %v1784_v32  ;;  %v1119_v39 = vpack.c.bf16 %v1105_v34, %v1104_v33  ;;  %v1082_v41 = vadd.f32 %v2231_v11, %v966_v35 }
 0x145   : > { %v1787_v40 = vpop.f32.mrf.mxu0 }
 0x146   : > { %v969_v42 = vadd.f32 %v1786_v38, %v968_v37  ;;  %1906 = vmatmul.mubr.bf16.gmra.mxu1 %v1119_v39  ;;  %v1106_v47 = vmax.f32 %v1082_v41, 0.0 }
 0x147   : > { %v1788_v43 = vpop.f32.mrf.mxu0 }
 0x148   : > { %v1083_v44 = vadd.f32 %v2231_v11, %v969_v42  ;;  %v1789_v45 = vadd.f32 %v1788_v43, %v1787_v40 }
 0x149   : > { %v1790_v46 = vpop.f32.mrf.mxu0 }
 0x14a   : > { %v1107_v48 = vmax.f32 %v1083_v44, 0.0  ;;  %v974_v49 = vadd.f32 %v1871_v14, %v1789_v45 }
 0x14b   : > { %v1791_v50 = vpop.f32.mrf.mxu0 }
 0x14c   : > { %v1792_v51 = vadd.f32 %v1791_v50, %v1790_v46  ;;  %v1120_v52 = vpack.c.bf16 %v1107_v48, %v1106_v47  ;;  %v1084_v53 = vadd.f32 %v2231_v11, %v974_v49 }
 0x14e   : > { %v977_v54 = vadd.f32 %v1872_v29, %v1792_v51  ;;  %1909 = vmatprep.mubr.bf16.mxu1 %v1120_v52  ;;  %v1108_v56 = vmax.f32 %v1084_v53, 0.0 }
 0x150   : > { %v1085_v55 = vadd.f32 %v2231_v11, %v977_v54 }
 0x152   : > { %v1109_v57 = vmax.f32 %v1085_v55, 0.0 }
 0x154   : > { %v1121_v58 = vpack.c.bf16 %v1109_v57, %v1108_v56 }
 0x156   : > { %1910 = vmatmul.mubr.bf16.gmra.mxu1 %v1121_v58 }
 0x1c6   : > { %v1891_v59 = vpop.f32.mrf.mxu1 }
 0x1c8   : > { %v1220_v60 = vpop.f32.mrf.mxu1 }
 0x1ca   : > { %v1892_v61 = vpop.f32.mrf.mxu1 }
 0x1cb   : > { %v1642_v62 = vpack.c.bf16 %v1892_v61, %v1891_v59 }
 0x1cc   : > { %v1223_v63 = vpop.f32.mrf.mxu1 }
 0x1cd   : > { %1694 = vst [vmem:[%s2261_s26 + $0x8] sm:$0xff] %v1642_v62   ;;  %v1637_v11 = vpack.c.bf16 %v1223_v63, %v1220_v60 }
 0x1cf   : > { %1638 = vst [vmem:[%s2261_s26] sm:$0xff] %v1637_v11  }
 0x1d6   : > { %v1895_v0 = vpop.f32.mrf.mxu1 }
 0x1d8   : > { %v1236_v1 = vpop.f32.mrf.mxu1 }
 0x1da   : > { %v1896_v2 = vpop.f32.mrf.mxu1 }
 0x1db   : > { %v1652_v3 = vpack.c.bf16 %v1896_v2, %v1895_v0 }
 0x1dc   : > { %v1239_v4 = vpop.f32.mrf.mxu1 }
 0x1dd   : > { %1696 = vst [vmem:[%s2261_s26 + $0x18] sm:$0xff] %v1652_v3   ;;  %v1647_v5 = vpack.c.bf16 %v1239_v4, %v1236_v1 }
 0x1df   : > { %1695 = vst [vmem:[%s2261_s26 + $0x10] sm:$0xff] %v1647_v5  }
 0x1e6   : > { %v1899_v6 = vpop.f32.mrf.mxu1 }
 0x1e8   : > { %v1252_v7 = vpop.f32.mrf.mxu1 }
 0x1ea   : > { %v1900_v8 = vpop.f32.mrf.mxu1 }
 0x1eb   : > { %v1662_v9 = vpack.c.bf16 %v1900_v8, %v1899_v6 }
 0x1ec   : > { %v1255_v10 = vpop.f32.mrf.mxu1 }
 0x1ed   : > { %1698 = vst [vmem:[%s2261_s26 + $0x28] sm:$0xff] %v1662_v9   ;;  %v1657_v12 = vpack.c.bf16 %v1255_v10, %v1252_v7 }
 0x1ef   : > { %1697 = vst [vmem:[%s2261_s26 + $0x20] sm:$0xff] %v1657_v12  }
 0x1f6   : > { %v1903_v13 = vpop.f32.mrf.mxu1 }
 0x1f8   : > { %v1268_v14 = vpop.f32.mrf.mxu1 }
 0x1fa   : > { %v1904_v15 = vpop.f32.mrf.mxu1 }
 0x1fb   : > { %v1672_v16 = vpack.c.bf16 %v1904_v15, %v1903_v13 }
 0x1fc   : > { %v1271_v17 = vpop.f32.mrf.mxu1 }
 0x1fd   : > { %1700 = vst [vmem:[%s2261_s26 + $0x38] sm:$0xff] %v1672_v16   ;;  %v1667_v18 = vpack.c.bf16 %v1271_v17, %v1268_v14 }
 0x1ff   : > { %1699 = vst [vmem:[%s2261_s26 + $0x30] sm:$0xff] %v1667_v18  }
 0x206   : > { %v1907_v19 = vpop.f32.mrf.mxu1 }
 0x208   : > { %v1284_v20 = vpop.f32.mrf.mxu1 }
 0x20a   : > { %v1908_v21 = vpop.f32.mrf.mxu1 }
 0x20b   : > { %v1682_v22 = vpack.c.bf16 %v1908_v21, %v1907_v19 }
 0x20c   : > { %v1287_v23 = vpop.f32.mrf.mxu1 }
 0x20d   : > { %1702 = vst [vmem:[%s2261_s26 + $0x48] sm:$0xff] %v1682_v22   ;;  %v1677_v24 = vpack.c.bf16 %v1287_v23, %v1284_v20 }
 0x20f   : > { %1701 = vst [vmem:[%s2261_s26 + $0x40] sm:$0xff] %v1677_v24  }
 0x216   : > { %v1911_v25 = vpop.f32.mrf.mxu1 }
 0x218   : > { %v1300_v26 = vpop.f32.mrf.mxu1 }
 0x21a   : > { %v1912_v27 = vpop.f32.mrf.mxu1 }
 0x21b   : > { %v1692_v28 = vpack.c.bf16 %v1912_v27, %v1911_v25 }
 0x21c   : > { %v1303_v29 = vpop.f32.mrf.mxu1 }
 0x21d   : > { %1704 = vst [vmem:[%s2261_s26 + $0x58] sm:$0xff] %v1692_v28   ;;  %v1687_v30 = vpack.c.bf16 %v1303_v29, %v1300_v26 }
 0x21f   : > { %1703 = vst [vmem:[%s2261_s26 + $0x50] sm:$0xff] %v1687_v30  }
 0x220 PF: > { %s14_s17 = sadd.s32 1, %s2040_s17   ;;  %s2289_s15 = smov %s2036_s16 }
 0x221   : > { %p11_p5 = scmp.ge.s32.totalorder %s14_s17, 4   ;;  %s2290_s16 = smov %s2292_s18 }
 0x223   :  { %13 = sbr.rel (!%p11_p5) target bundleno = 2 (0x2), region = 75 }

</bundles_post_ra>
